<compile_context>
chip_gen: v7x
topology: tpu7x:2x2x1
jax: 0.10.0
libtpu: 0.0.40
codegen_flags: <defaults>
</compile_context>

<pallas_src>
import math

import jax
import jax.numpy as jnp
from jax.experimental import pallas as pl
from jax.experimental.pallas import tpu as pltpu

# ----------------- small, module-consistent configuration -----------------
B = 2            # batch
EMB = 16         # embedding_dim (conv input height)
LOCAL = 3        # conv1 kernel height ("local")
N_MULTIV = 8     # number of univariate series == sequence length
N_KERNELS = 4    # conv output channels
W_KERNEL = 1     # conv kernel width (fixed to 1 as in the module docstring)
D_MODEL = 32
D_INNER = 64
N_LAYERS = 2
N_HEAD = 2
D_K = 16
D_V = 16
LN_EPS = 1e-5

N_WIN = EMB - LOCAL + 1          # real conv1 sliding windows (14)
BM = B * N_MULTIV                # batch folded into rows (16)
HB = N_HEAD * BM                 # packed attention rows (32)
HDK = N_HEAD * D_K               # 32
HDV = N_HEAD * D_V               # 32
N_BLOCKS = 128 // N_KERNELS      # 32 window slots -> conv1 block = one lane tile
CONV1_COLS = N_BLOCKS * N_KERNELS  # 128
assert N_BLOCKS >= N_WIN and D_K == D_V


def _layernorm(x, g, b):
    mu = jnp.mean(x, axis=-1, keepdims=True)
    var = jnp.mean((x - mu) ** 2, axis=-1, keepdims=True)
    return (x - mu) * jax.lax.rsqrt(var + LN_EPS) * g + b


# ---------------------------------------------------------------------------
# Fully fused kernel: conv features -> N_LAYERS encoder layers -> out_linear
# ---------------------------------------------------------------------------
def fused_attn_kernel(x_ref, conv_w_ref, conv_b_ref, in_w_ref, in_b_ref,
                      qkv_w_ref, qkv_b_ref, fc_w_ref, vecs_ref,
                      ffn_w1_ref, ffn_b1_ref, ffn_w2_ref,
                      out_w_ref, out_b_ref, head_mask_ref, attn_bias_ref,
                      out_ref):
    f32 = jnp.float32
    bf16 = jnp.bfloat16

    # ---- conv1 (all windows, padded to a full lane tile) + conv2: 1 push ----
    x_bf = x_ref[...].astype(bf16)                                    # (BM, EMB)
    z = jnp.dot(x_bf, conv_w_ref[...], preferred_element_type=f32)    # (BM, 132)

    z1 = z[:, :CONV1_COLS]        # (BM, 128) first lane tile (aligned view)
    z2 = z[:, CONV1_COLS:]        # (BM, 4)   second lane tile (aligned view)

    # AdaptiveMaxPool2d((1, M)) over windows as a cyclic roll+max all-reduce
    # on the XLU (pad blocks are duplicate windows, so max is unchanged).
    m = z1
    shift = CONV1_COLS // 2
    while shift >= N_KERNELS:
        m = jnp.maximum(m, pltpu.roll(m, shift=shift, axis=1))
        shift //= 2
    x1 = jnp.maximum(m[:, :N_KERNELS] + conv_b_ref[0:1, :], 0.0)      # (BM, K)
    x2 = jnp.maximum(z2 + conv_b_ref[1:2, :], 0.0)                    # (BM, K)
    # TODO(synk): dropout on x1/x2 is identity (eval / inference mode).

    # in_linear without the x1|x2 lane concat: two tiny matmuls on split rows.
    enc = (jnp.dot(x1.astype(bf16), in_w_ref[0], preferred_element_type=f32)
           + jnp.dot(x2.astype(bf16), in_w_ref[1], preferred_element_type=f32)
           + in_b_ref[...])                                           # (BM, D_MODEL)

    head_mask = head_mask_ref[...]    # (HB, HDK) {0,1}: keep own head's lanes
    attn_bias = attn_bias_ref[...]    # (HB, HB)  {0,-1e30}: head & batch blocks

    for l in range(N_LAYERS):                                         # static unroll
        # -------- multi-head self-attention (post-LN), packed over heads -----
        enc_bf = enc.astype(bf16)
        qkv = (jnp.dot(enc_bf, qkv_w_ref[l], preferred_element_type=f32)
               + qkv_b_ref[l])                                        # (BM, 3*H*D_K)
        q_cat = qkv[:, :HDK]            # offset-0 view (free)
        k_cat = qkv[:, HDK:2 * HDK]     # one XLU lane-rotate
        v_cat = qkv[:, 2 * HDK:]        # one XLU lane-rotate

        # head index onto the sublane axis via aligned replication; K/V keep
        # only their own head's lane block (block-diagonal structure).
        q_pk = jnp.concatenate([q_cat, q_cat], axis=0).astype(bf16)             # (HB, HDK)
        k_pk = (jnp.concatenate([k_cat, k_cat], axis=0) * head_mask).astype(bf16)
        v_pk = (jnp.concatenate([v_cat, v_cat], axis=0) * head_mask).astype(bf16)

        # ONE masked (HB, HB) score matmul for all heads & batch rows
        # (softmax scale already folded into the Q weights/bias).
        s = jax.lax.dot_general(q_pk, k_pk, (((1,), (1,)), ((), ())),
                                preferred_element_type=f32)           # (HB, HB) f32
        s = s + attn_bias
        s = s - jnp.max(s, axis=-1, keepdims=True)
        p = jnp.exp(s)                       # masked entries underflow to exactly 0
        p = p * pl.reciprocal(jnp.sum(p, axis=-1, keepdims=True), approx=True)

        # ONE context matmul; per-head outputs occupy disjoint (sublane-block,
        # lane-block) positions, so a sublane-aligned fold == head concat.
        c = jnp.dot(p.astype(bf16), v_pk, preferred_element_type=f32)  # (HB, HDV)
        o_cat = c[:BM, :] + c[BM:, :]                                  # (BM, H*D_V)

        vecs = vecs_ref[l]      # rows: fc_b, ln1_g, ln1_b, ffn_b2, ln2_g, ln2_b
        attn_out = (jnp.dot(o_cat.astype(bf16), fc_w_ref[l],
                            preferred_element_type=f32) + vecs[0:1, :])
        res1 = _layernorm(attn_out + enc, vecs[1:2, :], vecs[2:3, :])

        # -------- position-wise FFN (1x1 convs == linears) --------
        hid = jnp.maximum(
            jnp.dot(res1.astype(bf16), ffn_w1_ref[l], preferred_element_type=f32)
            + ffn_b1_ref[l], 0.0)
        ffn = (jnp.dot(hid.astype(bf16), ffn_w2_ref[l], preferred_element_type=f32)
               + vecs[3:4, :])
        enc = _layernorm(ffn + res1, vecs[4:5, :], vecs[5:6, :])

    # -------- out_linear, emitted directly from the fused kernel --------
    y = (jnp.dot(enc.astype(bf16), out_w_ref[...], preferred_element_type=f32)
         + out_b_ref[...])                                             # (BM, 2K)
    out_ref[...] = y.astype(out_ref.dtype)


# ---------------------------------------------------------------------------
# wrapper: single grid-less pallas_call, everything resident in VMEM.
# (With larger batches, add a leading "parallel" grid axis over batch groups
#  so v7x's two TensorCores are both used.)
# ---------------------------------------------------------------------------
def attn_module_forward(x_nchw, p):
    # x_nchw: (B, 1, EMB, N_MULTIV)  == x.view(-1, w_kernel, emb, n_multiv)
    x = x_nchw.reshape(B, EMB, N_MULTIV)
    # each (b, m) conv column becomes one row of a (B*M, EMB) slab
    x_rows = jnp.transpose(x, (0, 2, 1)).reshape(BM, EMB)
    out_flat = pl.pallas_call(
        fused_attn_kernel,
        out_shape=jax.ShapeDtypeStruct((BM, 2 * N_KERNELS), jnp.float32),
    )(x_rows, p["conv_w"], p["conv_b"], p["in_w"], p["in_b"],
      p["qkv_w"], p["qkv_b"], p["fc_w"], p["vecs"],
      p["ffn_w1"], p["ffn_b1"], p["ffn_w2"],
      p["out_w"], p["out_b"], p["head_mask"], p["attn_bias"])
    return (out_flat.reshape(B, N_MULTIV, 2 * N_KERNELS),)


# ---------------------------------------------------------------------------
# deterministic parameter construction (packed, bf16 matmul weights)
# ---------------------------------------------------------------------------
def init_params(key):
    f32, bf16 = jnp.float32, jnp.bfloat16

    def nrm(k, shape, scale=0.05):
        return scale * jax.random.normal(k, shape, dtype=f32)

    keys = iter(jax.random.split(key, 64))
    p = {}

    # conv1 (K, LOCAL) expanded into a banded matrix covering all sliding
    # windows, padded to N_BLOCKS=32 window slots (duplicates of real windows,
    # harmless under max) so the pooled block spans exactly one 128-lane tile;
    # conv2 (K, EMB) occupies the next, tile-aligned, 4 columns.
    w1 = nrm(next(keys), (N_KERNELS, LOCAL))
    b1 = nrm(next(keys), (1, N_KERNELS))
    w2 = nrm(next(keys), (N_KERNELS, EMB))
    b2 = nrm(next(keys), (1, N_KERNELS))
    cols = jnp.zeros((CONV1_COLS + N_KERNELS, EMB), f32)
    for blk in range(N_BLOCKS):
        h = blk % N_WIN
        cols = cols.at[blk * N_KERNELS:(blk + 1) * N_KERNELS, h:h + LOCAL].set(w1)
    cols = cols.at[CONV1_COLS:, :].set(w2)
    p["conv_w"] = cols.T.astype(bf16)                       # (EMB, 132)
    p["conv_b"] = jnp.concatenate([b1, b2], axis=0)         # (2, K) f32: [b1, b2]

    # in_linear: torch (D_MODEL, 2K) -> transposed and split into the x1- and
    # x2-facing row blocks (avoids the feats lane concat in the kernel).
    in_w = nrm(next(keys), (2 * N_KERNELS, D_MODEL))
    p["in_w"] = in_w.reshape(2, N_KERNELS, D_MODEL).astype(bf16)
    p["in_b"] = nrm(next(keys), (1, D_MODEL))

    scale = 1.0 / math.sqrt(D_K)
    qkv_w, qkv_b, fc_w, vecs, fw1, fb1, fw2 = [], [], [], [], [], [], []
    for _ in range(N_LAYERS):
        wq = nrm(next(keys), (D_MODEL, HDK)); bq = nrm(next(keys), (1, HDK))
        wk = nrm(next(keys), (D_MODEL, HDK)); bk = nrm(next(keys), (1, HDK))
        wv = nrm(next(keys), (D_MODEL, HDV)); bv = nrm(next(keys), (1, HDV))
        fcw = nrm(next(keys), (HDV, D_MODEL)); fcb = nrm(next(keys), (1, D_MODEL))
        w1f = nrm(next(keys), (D_MODEL, D_INNER)); b1f = nrm(next(keys), (1, D_INNER))
        w2f = nrm(next(keys), (D_INNER, D_MODEL)); b2f = nrm(next(keys), (1, D_MODEL))
        ln1g = jnp.ones((1, D_MODEL), f32); ln1b = jnp.zeros((1, D_MODEL), f32)
        ln2g = jnp.ones((1, D_MODEL), f32); ln2b = jnp.zeros((1, D_MODEL), f32)
        # 1/sqrt(d_k) softmax scale folded into the Q columns / bias (free on MXU)
        qkv_w.append(jnp.concatenate([wq * scale, wk, wv], axis=1))   # (D, 3*H*D_K)
        qkv_b.append(jnp.concatenate([bq * scale, bk, bv], axis=1))   # (1, 3*H*D_K)
        fc_w.append(fcw)
        vecs.append(jnp.concatenate([fcb, ln1g, ln1b, b2f, ln2g, ln2b], axis=0))
        fw1.append(w1f); fb1.append(b1f); fw2.append(w2f)

    p["qkv_w"] = jnp.stack(qkv_w).astype(bf16)   # (L, D_MODEL, 3*H*D_K)
    p["qkv_b"] = jnp.stack(qkv_b)                # (L, 1, 3*H*D_K) f32
    p["fc_w"] = jnp.stack(fc_w).astype(bf16)     # (L, H*D_V, D_MODEL)
    p["vecs"] = jnp.stack(vecs)                  # (L, 6, D_MODEL) f32
    p["ffn_w1"] = jnp.stack(fw1).astype(bf16)    # (L, D_MODEL, D_INNER)
    p["ffn_b1"] = jnp.stack(fb1)                 # (L, 1, D_INNER) f32
    p["ffn_w2"] = jnp.stack(fw2).astype(bf16)    # (L, D_INNER, D_MODEL)

    # out_linear: torch (2K, D_MODEL) -> stored transposed (D_MODEL, 2K)
    p["out_w"] = nrm(next(keys), (D_MODEL, 2 * N_KERNELS)).astype(bf16)
    p["out_b"] = nrm(next(keys), (1, 2 * N_KERNELS))

    # layout constants for the packed (head-on-sublane) attention
    row = jnp.arange(HB)
    lane = jnp.arange(HDK)
    p["head_mask"] = ((row[:, None] // BM) == (lane[None, :] // D_K)).astype(f32)
    same_head = (row[:, None] // BM) == (row[None, :] // BM)
    same_batch = ((row[:, None] % BM) // N_MULTIV) == ((row[None, :] % BM) // N_MULTIV)
    p["attn_bias"] = jnp.where(same_head & same_batch, 0.0, -1e30).astype(f32)
    return p


# ---------------------------------------------------------------------------
# pure-JAX (f32 activations) reference of the same forward pass
# ---------------------------------------------------------------------------
def reference_forward(x_nchw, p):
    x = x_nchw.reshape(B, EMB, N_MULTIV)
    xr = jnp.transpose(x, (0, 2, 1)).reshape(BM, EMB).astype(jnp.float32)
    z = xr @ p["conv_w"].astype(jnp.float32)
    wins = jnp.stack([z[:, h * N_KERNELS:(h + 1) * N_KERNELS] for h in range(N_WIN)], 0)
    x1 = jnp.maximum(jnp.max(wins, axis=0) + p["conv_b"][0:1, :], 0.0)
    x2 = jnp.maximum(z[:, CONV1_COLS:] + p["conv_b"][1:2, :], 0.0)
    enc = (x1 @ p["in_w"][0].astype(jnp.float32)
           + x2 @ p["in_w"][1].astype(jnp.float32) + p["in_b"])
    for l in range(N_LAYERS):
        qkv = enc @ p["qkv_w"][l].astype(jnp.float32) + p["qkv_b"][l]
        q, k, v = qkv[:, :HDK], qkv[:, HDK:2 * HDK], qkv[:, 2 * HDK:]
        heads = []
        for h in range(N_HEAD):
            qh = q[:, h * D_K:(h + 1) * D_K].reshape(B, N_MULTIV, D_K)
            kh = k[:, h * D_K:(h + 1) * D_K].reshape(B, N_MULTIV, D_K)
            vh = v[:, h * D_V:(h + 1) * D_V].reshape(B, N_MULTIV, D_V)
            s = jnp.einsum("bqd,bkd->bqk", qh, kh)          # scale folded into Wq
            attn = jax.nn.softmax(s, axis=-1)
            heads.append(jnp.einsum("bqk,bkd->bqd", attn, vh).reshape(BM, D_V))
        o = jnp.concatenate(heads, axis=-1)
        vec = p["vecs"][l]
        attn_out = o @ p["fc_w"][l].astype(jnp.float32) + vec[0:1, :]
        res1 = _layernorm(attn_out + enc, vec[1:2, :], vec[2:3, :])
        hid = jnp.maximum(res1 @ p["ffn_w1"][l].astype(jnp.float32) + p["ffn_b1"][l], 0.0)
        ffn = hid @ p["ffn_w2"][l].astype(jnp.float32) + vec[3:4, :]
        enc = _layernorm(ffn + res1, vec[4:5, :], vec[5:6, :])
    y = enc @ p["out_w"].astype(jnp.float32) + p["out_b"]
    return y.reshape(B, N_MULTIV, 2 * N_KERNELS)


if __name__ == "__main__":
    key = jax.random.PRNGKey(0)
    k_param, k_x = jax.random.split(key)
    params = init_params(k_param)
    x = jax.random.normal(k_x, (B, W_KERNEL, EMB, N_MULTIV), dtype=jnp.float32)

    fwd = jax.jit(attn_module_forward)
    (out,) = fwd(x, params)
    out = jax.block_until_ready(out)
    assert out.shape == (B, N_MULTIV, 2 * N_KERNELS), out.shape
    assert bool(jnp.all(jnp.isfinite(out)))

    # semantic sanity check vs. a pure-JAX f32 reference (tolerance covers the
    # bf16 matmul operands and the approximate softmax reciprocal).
    ref = reference_forward(x, params)
    assert bool(jnp.allclose(out, ref, atol=8e-2, rtol=8e-2)), \
        float(jnp.max(jnp.abs(out - ref)))
    print("KERNEL_OK")
</pallas_src>

<mosaic_0001>
module attributes {stable_mosaic.version = 11 : i64} {
  func.func @fused_attn_kernel(%arg0: memref<16x16xf32, #tpu.memory_space<vmem>>, %arg1: memref<16x132xbf16, #tpu.memory_space<vmem>>, %arg2: memref<2x4xf32, #tpu.memory_space<vmem>>, %arg3: memref<2x4x32xbf16, #tpu.memory_space<vmem>>, %arg4: memref<1x32xf32, #tpu.memory_space<vmem>>, %arg5: memref<2x32x96xbf16, #tpu.memory_space<vmem>>, %arg6: memref<2x1x96xf32, #tpu.memory_space<vmem>>, %arg7: memref<2x32x32xbf16, #tpu.memory_space<vmem>>, %arg8: memref<2x6x32xf32, #tpu.memory_space<vmem>>, %arg9: memref<2x32x64xbf16, #tpu.memory_space<vmem>>, %arg10: memref<2x1x64xf32, #tpu.memory_space<vmem>>, %arg11: memref<2x64x32xbf16, #tpu.memory_space<vmem>>, %arg12: memref<32x8xbf16, #tpu.memory_space<vmem>>, %arg13: memref<1x8xf32, #tpu.memory_space<vmem>>, %arg14: memref<32x32xf32, #tpu.memory_space<vmem>>, %arg15: memref<32x32xf32, #tpu.memory_space<vmem>>, %arg16: memref<16x8xf32, #tpu.memory_space<vmem>>) attributes {dimension_semantics = [], scalar_prefetch = 0 : i64, scratch_operands = 0 : i64, tpu.core_type = #tpu.core_type<tc>} {
    %c0 = arith.constant 0 : index
    %c0_0 = arith.constant 0 : index
    %0 = vector.load %arg0[%c0, %c0_0] : memref<16x16xf32, #tpu.memory_space<vmem>>, vector<16x16xf32>
    %1 = arith.truncf %0 : vector<16x16xf32> to vector<16x16xbf16>
    %c0_1 = arith.constant 0 : index
    %c0_2 = arith.constant 0 : index
    %2 = vector.load %arg1[%c0_1, %c0_2] : memref<16x132xbf16, #tpu.memory_space<vmem>>, vector<16x132xbf16>
    %cst = arith.constant dense<0.000000e+00> : vector<16x132xf32>
    %3 = tpu.matmul %1, %2, %cst {dimension_numbers = #tpu.dot_dimension_numbers<[1], [0], [0], [1], [0, 0, 1, 1], [], []>} : vector<16x16xbf16>, vector<16x132xbf16>, vector<16x132xf32> -> vector<16x132xf32>
    %4 = vector.extract_strided_slice %3 {offsets = [0, 0], sizes = [16, 128], strides = [1, 1]} : vector<16x132xf32> to vector<16x128xf32>
    %5 = vector.extract_strided_slice %3 {offsets = [0, 128], sizes = [16, 4], strides = [1, 1]} : vector<16x132xf32> to vector<16x4xf32>
    %c64_i32 = arith.constant 64 : i32
    %6 = tpu.dynamic_rotate %4 by %c64_i32 dim 1 : vector<16x128xf32>, i32 -> vector<16x128xf32>
    %7 = arith.maximumf %4, %6 : vector<16x128xf32>
    %c32_i32 = arith.constant 32 : i32
    %8 = tpu.dynamic_rotate %7 by %c32_i32 dim 1 : vector<16x128xf32>, i32 -> vector<16x128xf32>
    %9 = arith.maximumf %7, %8 : vector<16x128xf32>
    %c16_i32 = arith.constant 16 : i32
    %10 = tpu.dynamic_rotate %9 by %c16_i32 dim 1 : vector<16x128xf32>, i32 -> vector<16x128xf32>
    %11 = arith.maximumf %9, %10 : vector<16x128xf32>
    %c8_i32 = arith.constant 8 : i32
    %12 = tpu.dynamic_rotate %11 by %c8_i32 dim 1 : vector<16x128xf32>, i32 -> vector<16x128xf32>
    %13 = arith.maximumf %11, %12 : vector<16x128xf32>
    %c4_i32 = arith.constant 4 : i32
    %14 = tpu.dynamic_rotate %13 by %c4_i32 dim 1 : vector<16x128xf32>, i32 -> vector<16x128xf32>
    %15 = arith.maximumf %13, %14 : vector<16x128xf32>
    %16 = vector.extract_strided_slice %15 {offsets = [0, 0], sizes = [16, 4], strides = [1, 1]} : vector<16x128xf32> to vector<16x4xf32>
    %c0_3 = arith.constant 0 : index
    %c0_4 = arith.constant 0 : index
    %17 = vector.load %arg2[%c0_3, %c0_4] : memref<2x4xf32, #tpu.memory_space<vmem>>, vector<1x4xf32>
    %18 = vector.broadcast %17 : vector<1x4xf32> to vector<16x4xf32>
    %19 = arith.addf %16, %18 : vector<16x4xf32>
    %cst_5 = arith.constant 0.000000e+00 : f32
    %20 = vector.broadcast %cst_5 : f32 to vector<16x4xf32>
    %21 = arith.maximumf %19, %20 : vector<16x4xf32>
    %c1 = arith.constant 1 : index
    %c0_6 = arith.constant 0 : index
    %22 = vector.load %arg2[%c1, %c0_6] : memref<2x4xf32, #tpu.memory_space<vmem>>, vector<1x4xf32>
    %23 = vector.broadcast %22 : vector<1x4xf32> to vector<16x4xf32>
    %24 = arith.addf %5, %23 : vector<16x4xf32>
    %cst_7 = arith.constant 0.000000e+00 : f32
    %25 = vector.broadcast %cst_7 : f32 to vector<16x4xf32>
    %26 = arith.maximumf %24, %25 : vector<16x4xf32>
    %27 = arith.truncf %21 : vector<16x4xf32> to vector<16x4xbf16>
    %c0_8 = arith.constant 0 : index
    %c0_9 = arith.constant 0 : index
    %c0_10 = arith.constant 0 : index
    %28 = vector.load %arg3[%c0_8, %c0_9, %c0_10] : memref<2x4x32xbf16, #tpu.memory_space<vmem>>, vector<1x4x32xbf16>
    %29 = vector.shape_cast %28 : vector<1x4x32xbf16> to vector<4x32xbf16>
    %cst_11 = arith.constant dense<0.000000e+00> : vector<16x32xf32>
    %30 = tpu.matmul %27, %29, %cst_11 {dimension_numbers = #tpu.dot_dimension_numbers<[1], [0], [0], [1], [0, 0, 1, 1], [], []>} : vector<16x4xbf16>, vector<4x32xbf16>, vector<16x32xf32> -> vector<16x32xf32>
    %31 = arith.truncf %26 : vector<16x4xf32> to vector<16x4xbf16>
    %c1_12 = arith.constant 1 : index
    %c0_13 = arith.constant 0 : index
    %c0_14 = arith.constant 0 : index
    %32 = vector.load %arg3[%c1_12, %c0_13, %c0_14] : memref<2x4x32xbf16, #tpu.memory_space<vmem>>, vector<1x4x32xbf16>
    %33 = vector.shape_cast %32 : vector<1x4x32xbf16> to vector<4x32xbf16>
    %cst_15 = arith.constant dense<0.000000e+00> : vector<16x32xf32>
    %34 = tpu.matmul %31, %33, %cst_15 {dimension_numbers = #tpu.dot_dimension_numbers<[1], [0], [0], [1], [0, 0, 1, 1], [], []>} : vector<16x4xbf16>, vector<4x32xbf16>, vector<16x32xf32> -> vector<16x32xf32>
    %35 = arith.addf %30, %34 : vector<16x32xf32>
    %c0_16 = arith.constant 0 : index
    %c0_17 = arith.constant 0 : index
    %36 = vector.load %arg4[%c0_16, %c0_17] : memref<1x32xf32, #tpu.memory_space<vmem>>, vector<1x32xf32>
    %37 = vector.broadcast %36 : vector<1x32xf32> to vector<16x32xf32>
    %38 = arith.addf %35, %37 : vector<16x32xf32>
    %c0_18 = arith.constant 0 : index
    %c0_19 = arith.constant 0 : index
    %39 = vector.load %arg14[%c0_18, %c0_19] : memref<32x32xf32, #tpu.memory_space<vmem>>, vector<32x32xf32>
    %c0_20 = arith.constant 0 : index
    %c0_21 = arith.constant 0 : index
    %40 = vector.load %arg15[%c0_20, %c0_21] : memref<32x32xf32, #tpu.memory_space<vmem>>, vector<32x32xf32>
    %41 = arith.truncf %38 : vector<16x32xf32> to vector<16x32xbf16>
    %c0_22 = arith.constant 0 : index
    %c0_23 = arith.constant 0 : index
    %c0_24 = arith.constant 0 : index
    %42 = vector.load %arg5[%c0_22, %c0_23, %c0_24] : memref<2x32x96xbf16, #tpu.memory_space<vmem>>, vector<1x32x96xbf16>
    %43 = vector.shape_cast %42 : vector<1x32x96xbf16> to vector<32x96xbf16>
    %cst_25 = arith.constant dense<0.000000e+00> : vector<16x96xf32>
    %44 = tpu.matmul %41, %43, %cst_25 {dimension_numbers = #tpu.dot_dimension_numbers<[1], [0], [0], [1], [0, 0, 1, 1], [], []>} : vector<16x32xbf16>, vector<32x96xbf16>, vector<16x96xf32> -> vector<16x96xf32>
    %c0_26 = arith.constant 0 : index
    %c0_27 = arith.constant 0 : index
    %c0_28 = arith.constant 0 : index
    %45 = vector.load %arg6[%c0_26, %c0_27, %c0_28] : memref<2x1x96xf32, #tpu.memory_space<vmem>>, vector<1x1x96xf32>
    %46 = vector.shape_cast %45 : vector<1x1x96xf32> to vector<1x96xf32>
    %47 = vector.broadcast %46 : vector<1x96xf32> to vector<16x96xf32>
    %48 = arith.addf %44, %47 : vector<16x96xf32>
    %49 = vector.extract_strided_slice %48 {offsets = [0, 0], sizes = [16, 32], strides = [1, 1]} : vector<16x96xf32> to vector<16x32xf32>
    %50 = vector.extract_strided_slice %48 {offsets = [0, 32], sizes = [16, 32], strides = [1, 1]} : vector<16x96xf32> to vector<16x32xf32>
    %51 = vector.extract_strided_slice %48 {offsets = [0, 64], sizes = [16, 32], strides = [1, 1]} : vector<16x96xf32> to vector<16x32xf32>
    %52 = tpu.concatenate %49, %49 in 0 : vector<16x32xf32>, vector<16x32xf32> -> vector<32x32xf32>
    %53 = arith.truncf %52 : vector<32x32xf32> to vector<32x32xbf16>
    %54 = tpu.concatenate %50, %50 in 0 : vector<16x32xf32>, vector<16x32xf32> -> vector<32x32xf32>
    %55 = arith.mulf %54, %39 : vector<32x32xf32>
    %56 = arith.truncf %55 : vector<32x32xf32> to vector<32x32xbf16>
    %57 = tpu.concatenate %51, %51 in 0 : vector<16x32xf32>, vector<16x32xf32> -> vector<32x32xf32>
    %58 = arith.mulf %57, %39 : vector<32x32xf32>
    %59 = arith.truncf %58 : vector<32x32xf32> to vector<32x32xbf16>
    %cst_29 = arith.constant dense<0.000000e+00> : vector<32x32xf32>
    %60 = tpu.matmul %53, %56, %cst_29 {dimension_numbers = #tpu.dot_dimension_numbers<[1], [1], [0], [0], [0, 0, 1, 0], [], []>} : vector<32x32xbf16>, vector<32x32xbf16>, vector<32x32xf32> -> vector<32x32xf32>
    %61 = arith.addf %60, %40 : vector<32x32xf32>
    %cst_30 = arith.constant dense<0xFF800000> : vector<32xf32>
    %62 = vector.multi_reduction <maximumf>, %61, %cst_30 [1] : vector<32x32xf32> to vector<32xf32>
    %63 = vector.shape_cast %62 : vector<32xf32> to vector<32x1xf32>
    %64 = vector.broadcast %63 : vector<32x1xf32> to vector<32x32xf32>
    %65 = arith.subf %61, %64 : vector<32x32xf32>
    %66 = math.exp %65 : vector<32x32xf32>
    %cst_31 = arith.constant dense<0.000000e+00> : vector<32xf32>
    %67 = vector.multi_reduction <add>, %66, %cst_31 [1] : vector<32x32xf32> to vector<32xf32>
    %68 = vector.shape_cast %67 : vector<32xf32> to vector<32x1xf32>
    %69 = tpu.reciprocal %68 {approx = true} : vector<32x1xf32> -> vector<32x1xf32>
    %70 = vector.broadcast %69 : vector<32x1xf32> to vector<32x32xf32>
    %71 = arith.mulf %66, %70 : vector<32x32xf32>
    %72 = arith.truncf %71 : vector<32x32xf32> to vector<32x32xbf16>
    %cst_32 = arith.constant dense<0.000000e+00> : vector<32x32xf32>
    %73 = tpu.matmul %72, %59, %cst_32 {dimension_numbers = #tpu.dot_dimension_numbers<[1], [0], [0], [1], [0, 0, 1, 1], [], []>} : vector<32x32xbf16>, vector<32x32xbf16>, vector<32x32xf32> -> vector<32x32xf32>
    %74 = vector.extract_strided_slice %73 {offsets = [0, 0], sizes = [16, 32], strides = [1, 1]} : vector<32x32xf32> to vector<16x32xf32>
    %75 = vector.extract_strided_slice %73 {offsets = [16, 0], sizes = [16, 32], strides = [1, 1]} : vector<32x32xf32> to vector<16x32xf32>
    %76 = arith.addf %74, %75 : vector<16x32xf32>
    %c0_33 = arith.constant 0 : index
    %c0_34 = arith.constant 0 : index
    %c0_35 = arith.constant 0 : index
    %77 = vector.load %arg8[%c0_33, %c0_34, %c0_35] : memref<2x6x32xf32, #tpu.memory_space<vmem>>, vector<1x6x32xf32>
    %78 = vector.shape_cast %77 : vector<1x6x32xf32> to vector<6x32xf32>
    %79 = arith.truncf %76 : vector<16x32xf32> to vector<16x32xbf16>
    %c0_36 = arith.constant 0 : index
    %c0_37 = arith.constant 0 : index
    %c0_38 = arith.constant 0 : index
    %80 = vector.load %arg7[%c0_36, %c0_37, %c0_38] : memref<2x32x32xbf16, #tpu.memory_space<vmem>>, vector<1x32x32xbf16>
    %81 = vector.shape_cast %80 : vector<1x32x32xbf16> to vector<32x32xbf16>
    %cst_39 = arith.constant dense<0.000000e+00> : vector<16x32xf32>
    %82 = tpu.matmul %79, %81, %cst_39 {dimension_numbers = #tpu.dot_dimension_numbers<[1], [0], [0], [1], [0, 0, 1, 1], [], []>} : vector<16x32xbf16>, vector<32x32xbf16>, vector<16x32xf32> -> vector<16x32xf32>
    %83 = vector.extract_strided_slice %78 {offsets = [0, 0], sizes = [1, 32], strides = [1, 1]} : vector<6x32xf32> to vector<1x32xf32>
    %84 = vector.broadcast %83 : vector<1x32xf32> to vector<16x32xf32>
    %85 = arith.addf %82, %84 : vector<16x32xf32>
    %86 = arith.addf %85, %38 : vector<16x32xf32>
    %87 = vector.extract_strided_slice %78 {offsets = [1, 0], sizes = [1, 32], strides = [1, 1]} : vector<6x32xf32> to vector<1x32xf32>
    %88 = vector.extract_strided_slice %78 {offsets = [2, 0], sizes = [1, 32], strides = [1, 1]} : vector<6x32xf32> to vector<1x32xf32>
    %cst_40 = arith.constant dense<0.000000e+00> : vector<16xf32>
    %89 = vector.multi_reduction <add>, %86, %cst_40 [1] : vector<16x32xf32> to vector<16xf32>
    %90 = vector.shape_cast %89 : vector<16xf32> to vector<16x1xf32>
    %cst_41 = arith.constant 3.200000e+01 : f32
    %91 = vector.broadcast %cst_41 : f32 to vector<16x1xf32>
    %92 = arith.divf %90, %91 : vector<16x1xf32>
    %93 = vector.broadcast %92 : vector<16x1xf32> to vector<16x32xf32>
    %94 = arith.subf %86, %93 : vector<16x32xf32>
    %95 = arith.mulf %94, %94 : vector<16x32xf32>
    %cst_42 = arith.constant dense<0.000000e+00> : vector<16xf32>
    %96 = vector.multi_reduction <add>, %95, %cst_42 [1] : vector<16x32xf32> to vector<16xf32>
    %97 = vector.shape_cast %96 : vector<16xf32> to vector<16x1xf32>
    %cst_43 = arith.constant 3.200000e+01 : f32
    %98 = vector.broadcast %cst_43 : f32 to vector<16x1xf32>
    %99 = arith.divf %97, %98 : vector<16x1xf32>
    %100 = vector.broadcast %92 : vector<16x1xf32> to vector<16x32xf32>
    %101 = arith.subf %86, %100 : vector<16x32xf32>
    %cst_44 = arith.constant 9.99999974E-6 : f32
    %102 = vector.broadcast %cst_44 : f32 to vector<16x1xf32>
    %103 = arith.addf %99, %102 : vector<16x1xf32>
    %104 = math.rsqrt %103 : vector<16x1xf32>
    %105 = vector.broadcast %104 : vector<16x1xf32> to vector<16x32xf32>
    %106 = arith.mulf %101, %105 : vector<16x32xf32>
    %107 = vector.broadcast %87 : vector<1x32xf32> to vector<16x32xf32>
    %108 = arith.mulf %106, %107 : vector<16x32xf32>
    %109 = vector.broadcast %88 : vector<1x32xf32> to vector<16x32xf32>
    %110 = arith.addf %108, %109 : vector<16x32xf32>
    %111 = arith.truncf %110 : vector<16x32xf32> to vector<16x32xbf16>
    %c0_45 = arith.constant 0 : index
    %c0_46 = arith.constant 0 : index
    %c0_47 = arith.constant 0 : index
    %112 = vector.load %arg9[%c0_45, %c0_46, %c0_47] : memref<2x32x64xbf16, #tpu.memory_space<vmem>>, vector<1x32x64xbf16>
    %113 = vector.shape_cast %112 : vector<1x32x64xbf16> to vector<32x64xbf16>
    %cst_48 = arith.constant dense<0.000000e+00> : vector<16x64xf32>
    %114 = tpu.matmul %111, %113, %cst_48 {dimension_numbers = #tpu.dot_dimension_numbers<[1], [0], [0], [1], [0, 0, 1, 1], [], []>} : vector<16x32xbf16>, vector<32x64xbf16>, vector<16x64xf32> -> vector<16x64xf32>
    %c0_49 = arith.constant 0 : index
    %c0_50 = arith.constant 0 : index
    %c0_51 = arith.constant 0 : index
    %115 = vector.load %arg10[%c0_49, %c0_50, %c0_51] : memref<2x1x64xf32, #tpu.memory_space<vmem>>, vector<1x1x64xf32>
    %116 = vector.shape_cast %115 : vector<1x1x64xf32> to vector<1x64xf32>
    %117 = vector.broadcast %116 : vector<1x64xf32> to vector<16x64xf32>
    %118 = arith.addf %114, %117 : vector<16x64xf32>
    %cst_52 = arith.constant 0.000000e+00 : f32
    %119 = vector.broadcast %cst_52 : f32 to vector<16x64xf32>
    %120 = arith.maximumf %118, %119 : vector<16x64xf32>
    %121 = arith.truncf %120 : vector<16x64xf32> to vector<16x64xbf16>
    %c0_53 = arith.constant 0 : index
    %c0_54 = arith.constant 0 : index
    %c0_55 = arith.constant 0 : index
    %122 = vector.load %arg11[%c0_53, %c0_54, %c0_55] : memref<2x64x32xbf16, #tpu.memory_space<vmem>>, vector<1x64x32xbf16>
    %123 = vector.shape_cast %122 : vector<1x64x32xbf16> to vector<64x32xbf16>
    %cst_56 = arith.constant dense<0.000000e+00> : vector<16x32xf32>
    %124 = tpu.matmul %121, %123, %cst_56 {dimension_numbers = #tpu.dot_dimension_numbers<[1], [0], [0], [1], [0, 0, 1, 1], [], []>} : vector<16x64xbf16>, vector<64x32xbf16>, vector<16x32xf32> -> vector<16x32xf32>
    %125 = vector.extract_strided_slice %78 {offsets = [3, 0], sizes = [1, 32], strides = [1, 1]} : vector<6x32xf32> to vector<1x32xf32>
    %126 = vector.broadcast %125 : vector<1x32xf32> to vector<16x32xf32>
    %127 = arith.addf %124, %126 : vector<16x32xf32>
    %128 = arith.addf %127, %110 : vector<16x32xf32>
    %129 = vector.extract_strided_slice %78 {offsets = [4, 0], sizes = [1, 32], strides = [1, 1]} : vector<6x32xf32> to vector<1x32xf32>
    %130 = vector.extract_strided_slice %78 {offsets = [5, 0], sizes = [1, 32], strides = [1, 1]} : vector<6x32xf32> to vector<1x32xf32>
    %cst_57 = arith.constant dense<0.000000e+00> : vector<16xf32>
    %131 = vector.multi_reduction <add>, %128, %cst_57 [1] : vector<16x32xf32> to vector<16xf32>
    %132 = vector.shape_cast %131 : vector<16xf32> to vector<16x1xf32>
    %cst_58 = arith.constant 3.200000e+01 : f32
    %133 = vector.broadcast %cst_58 : f32 to vector<16x1xf32>
    %134 = arith.divf %132, %133 : vector<16x1xf32>
    %135 = vector.broadcast %134 : vector<16x1xf32> to vector<16x32xf32>
    %136 = arith.subf %128, %135 : vector<16x32xf32>
    %137 = arith.mulf %136, %136 : vector<16x32xf32>
    %cst_59 = arith.constant dense<0.000000e+00> : vector<16xf32>
    %138 = vector.multi_reduction <add>, %137, %cst_59 [1] : vector<16x32xf32> to vector<16xf32>
    %139 = vector.shape_cast %138 : vector<16xf32> to vector<16x1xf32>
    %cst_60 = arith.constant 3.200000e+01 : f32
    %140 = vector.broadcast %cst_60 : f32 to vector<16x1xf32>
    %141 = arith.divf %139, %140 : vector<16x1xf32>
    %142 = vector.broadcast %134 : vector<16x1xf32> to vector<16x32xf32>
    %143 = arith.subf %128, %142 : vector<16x32xf32>
    %cst_61 = arith.constant 9.99999974E-6 : f32
    %144 = vector.broadcast %cst_61 : f32 to vector<16x1xf32>
    %145 = arith.addf %141, %144 : vector<16x1xf32>
    %146 = math.rsqrt %145 : vector<16x1xf32>
    %147 = vector.broadcast %146 : vector<16x1xf32> to vector<16x32xf32>
    %148 = arith.mulf %143, %147 : vector<16x32xf32>
    %149 = vector.broadcast %129 : vector<1x32xf32> to vector<16x32xf32>
    %150 = arith.mulf %148, %149 : vector<16x32xf32>
    %151 = vector.broadcast %130 : vector<1x32xf32> to vector<16x32xf32>
    %152 = arith.addf %150, %151 : vector<16x32xf32>
    %153 = arith.truncf %152 : vector<16x32xf32> to vector<16x32xbf16>
    %c1_62 = arith.constant 1 : index
    %c0_63 = arith.constant 0 : index
    %c0_64 = arith.constant 0 : index
    %154 = vector.load %arg5[%c1_62, %c0_63, %c0_64] : memref<2x32x96xbf16, #tpu.memory_space<vmem>>, vector<1x32x96xbf16>
    %155 = vector.shape_cast %154 : vector<1x32x96xbf16> to vector<32x96xbf16>
    %cst_65 = arith.constant dense<0.000000e+00> : vector<16x96xf32>
    %156 = tpu.matmul %153, %155, %cst_65 {dimension_numbers = #tpu.dot_dimension_numbers<[1], [0], [0], [1], [0, 0, 1, 1], [], []>} : vector<16x32xbf16>, vector<32x96xbf16>, vector<16x96xf32> -> vector<16x96xf32>
    %c1_66 = arith.constant 1 : index
    %c0_67 = arith.constant 0 : index
    %c0_68 = arith.constant 0 : index
    %157 = vector.load %arg6[%c1_66, %c0_67, %c0_68] : memref<2x1x96xf32, #tpu.memory_space<vmem>>, vector<1x1x96xf32>
    %158 = vector.shape_cast %157 : vector<1x1x96xf32> to vector<1x96xf32>
    %159 = vector.broadcast %158 : vector<1x96xf32> to vector<16x96xf32>
    %160 = arith.addf %156, %159 : vector<16x96xf32>
    %161 = vector.extract_strided_slice %160 {offsets = [0, 0], sizes = [16, 32], strides = [1, 1]} : vector<16x96xf32> to vector<16x32xf32>
    %162 = vector.extract_strided_slice %160 {offsets = [0, 32], sizes = [16, 32], strides = [1, 1]} : vector<16x96xf32> to vector<16x32xf32>
    %163 = vector.extract_strided_slice %160 {offsets = [0, 64], sizes = [16, 32], strides = [1, 1]} : vector<16x96xf32> to vector<16x32xf32>
    %164 = tpu.concatenate %161, %161 in 0 : vector<16x32xf32>, vector<16x32xf32> -> vector<32x32xf32>
    %165 = arith.truncf %164 : vector<32x32xf32> to vector<32x32xbf16>
    %166 = tpu.concatenate %162, %162 in 0 : vector<16x32xf32>, vector<16x32xf32> -> vector<32x32xf32>
    %167 = arith.mulf %166, %39 : vector<32x32xf32>
    %168 = arith.truncf %167 : vector<32x32xf32> to vector<32x32xbf16>
    %169 = tpu.concatenate %163, %163 in 0 : vector<16x32xf32>, vector<16x32xf32> -> vector<32x32xf32>
    %170 = arith.mulf %169, %39 : vector<32x32xf32>
    %171 = arith.truncf %170 : vector<32x32xf32> to vector<32x32xbf16>
    %cst_69 = arith.constant dense<0.000000e+00> : vector<32x32xf32>
    %172 = tpu.matmul %165, %168, %cst_69 {dimension_numbers = #tpu.dot_dimension_numbers<[1], [1], [0], [0], [0, 0, 1, 0], [], []>} : vector<32x32xbf16>, vector<32x32xbf16>, vector<32x32xf32> -> vector<32x32xf32>
    %173 = arith.addf %172, %40 : vector<32x32xf32>
    %cst_70 = arith.constant dense<0xFF800000> : vector<32xf32>
    %174 = vector.multi_reduction <maximumf>, %173, %cst_70 [1] : vector<32x32xf32> to vector<32xf32>
    %175 = vector.shape_cast %174 : vector<32xf32> to vector<32x1xf32>
    %176 = vector.broadcast %175 : vector<32x1xf32> to vector<32x32xf32>
    %177 = arith.subf %173, %176 : vector<32x32xf32>
    %178 = math.exp %177 : vector<32x32xf32>
    %cst_71 = arith.constant dense<0.000000e+00> : vector<32xf32>
    %179 = vector.multi_reduction <add>, %178, %cst_71 [1] : vector<32x32xf32> to vector<32xf32>
    %180 = vector.shape_cast %179 : vector<32xf32> to vector<32x1xf32>
    %181 = tpu.reciprocal %180 {approx = true} : vector<32x1xf32> -> vector<32x1xf32>
    %182 = vector.broadcast %181 : vector<32x1xf32> to vector<32x32xf32>
    %183 = arith.mulf %178, %182 : vector<32x32xf32>
    %184 = arith.truncf %183 : vector<32x32xf32> to vector<32x32xbf16>
    %cst_72 = arith.constant dense<0.000000e+00> : vector<32x32xf32>
    %185 = tpu.matmul %184, %171, %cst_72 {dimension_numbers = #tpu.dot_dimension_numbers<[1], [0], [0], [1], [0, 0, 1, 1], [], []>} : vector<32x32xbf16>, vector<32x32xbf16>, vector<32x32xf32> -> vector<32x32xf32>
    %186 = vector.extract_strided_slice %185 {offsets = [0, 0], sizes = [16, 32], strides = [1, 1]} : vector<32x32xf32> to vector<16x32xf32>
    %187 = vector.extract_strided_slice %185 {offsets = [16, 0], sizes = [16, 32], strides = [1, 1]} : vector<32x32xf32> to vector<16x32xf32>
    %188 = arith.addf %186, %187 : vector<16x32xf32>
    %c1_73 = arith.constant 1 : index
    %c0_74 = arith.constant 0 : index
    %c0_75 = arith.constant 0 : index
    %189 = vector.load %arg8[%c1_73, %c0_74, %c0_75] : memref<2x6x32xf32, #tpu.memory_space<vmem>>, vector<1x6x32xf32>
    %190 = vector.shape_cast %189 : vector<1x6x32xf32> to vector<6x32xf32>
    %191 = arith.truncf %188 : vector<16x32xf32> to vector<16x32xbf16>
    %c1_76 = arith.constant 1 : index
    %c0_77 = arith.constant 0 : index
    %c0_78 = arith.constant 0 : index
    %192 = vector.load %arg7[%c1_76, %c0_77, %c0_78] : memref<2x32x32xbf16, #tpu.memory_space<vmem>>, vector<1x32x32xbf16>
    %193 = vector.shape_cast %192 : vector<1x32x32xbf16> to vector<32x32xbf16>
    %cst_79 = arith.constant dense<0.000000e+00> : vector<16x32xf32>
    %194 = tpu.matmul %191, %193, %cst_79 {dimension_numbers = #tpu.dot_dimension_numbers<[1], [0], [0], [1], [0, 0, 1, 1], [], []>} : vector<16x32xbf16>, vector<32x32xbf16>, vector<16x32xf32> -> vector<16x32xf32>
    %195 = vector.extract_strided_slice %190 {offsets = [0, 0], sizes = [1, 32], strides = [1, 1]} : vector<6x32xf32> to vector<1x32xf32>
    %196 = vector.broadcast %195 : vector<1x32xf32> to vector<16x32xf32>
    %197 = arith.addf %194, %196 : vector<16x32xf32>
    %198 = arith.addf %197, %152 : vector<16x32xf32>
    %199 = vector.extract_strided_slice %190 {offsets = [1, 0], sizes = [1, 32], strides = [1, 1]} : vector<6x32xf32> to vector<1x32xf32>
    %200 = vector.extract_strided_slice %190 {offsets = [2, 0], sizes = [1, 32], strides = [1, 1]} : vector<6x32xf32> to vector<1x32xf32>
    %cst_80 = arith.constant dense<0.000000e+00> : vector<16xf32>
    %201 = vector.multi_reduction <add>, %198, %cst_80 [1] : vector<16x32xf32> to vector<16xf32>
    %202 = vector.shape_cast %201 : vector<16xf32> to vector<16x1xf32>
    %cst_81 = arith.constant 3.200000e+01 : f32
    %203 = vector.broadcast %cst_81 : f32 to vector<16x1xf32>
    %204 = arith.divf %202, %203 : vector<16x1xf32>
    %205 = vector.broadcast %204 : vector<16x1xf32> to vector<16x32xf32>
    %206 = arith.subf %198, %205 : vector<16x32xf32>
    %207 = arith.mulf %206, %206 : vector<16x32xf32>
    %cst_82 = arith.constant dense<0.000000e+00> : vector<16xf32>
    %208 = vector.multi_reduction <add>, %207, %cst_82 [1] : vector<16x32xf32> to vector<16xf32>
    %209 = vector.shape_cast %208 : vector<16xf32> to vector<16x1xf32>
    %cst_83 = arith.constant 3.200000e+01 : f32
    %210 = vector.broadcast %cst_83 : f32 to vector<16x1xf32>
    %211 = arith.divf %209, %210 : vector<16x1xf32>
    %212 = vector.broadcast %204 : vector<16x1xf32> to vector<16x32xf32>
    %213 = arith.subf %198, %212 : vector<16x32xf32>
    %cst_84 = arith.constant 9.99999974E-6 : f32
    %214 = vector.broadcast %cst_84 : f32 to vector<16x1xf32>
    %215 = arith.addf %211, %214 : vector<16x1xf32>
    %216 = math.rsqrt %215 : vector<16x1xf32>
    %217 = vector.broadcast %216 : vector<16x1xf32> to vector<16x32xf32>
    %218 = arith.mulf %213, %217 : vector<16x32xf32>
    %219 = vector.broadcast %199 : vector<1x32xf32> to vector<16x32xf32>
    %220 = arith.mulf %218, %219 : vector<16x32xf32>
    %221 = vector.broadcast %200 : vector<1x32xf32> to vector<16x32xf32>
    %222 = arith.addf %220, %221 : vector<16x32xf32>
    %223 = arith.truncf %222 : vector<16x32xf32> to vector<16x32xbf16>
    %c1_85 = arith.constant 1 : index
    %c0_86 = arith.constant 0 : index
    %c0_87 = arith.constant 0 : index
    %224 = vector.load %arg9[%c1_85, %c0_86, %c0_87] : memref<2x32x64xbf16, #tpu.memory_space<vmem>>, vector<1x32x64xbf16>
    %225 = vector.shape_cast %224 : vector<1x32x64xbf16> to vector<32x64xbf16>
    %cst_88 = arith.constant dense<0.000000e+00> : vector<16x64xf32>
    %226 = tpu.matmul %223, %225, %cst_88 {dimension_numbers = #tpu.dot_dimension_numbers<[1], [0], [0], [1], [0, 0, 1, 1], [], []>} : vector<16x32xbf16>, vector<32x64xbf16>, vector<16x64xf32> -> vector<16x64xf32>
    %c1_89 = arith.constant 1 : index
    %c0_90 = arith.constant 0 : index
    %c0_91 = arith.constant 0 : index
    %227 = vector.load %arg10[%c1_89, %c0_90, %c0_91] : memref<2x1x64xf32, #tpu.memory_space<vmem>>, vector<1x1x64xf32>
    %228 = vector.shape_cast %227 : vector<1x1x64xf32> to vector<1x64xf32>
    %229 = vector.broadcast %228 : vector<1x64xf32> to vector<16x64xf32>
    %230 = arith.addf %226, %229 : vector<16x64xf32>
    %cst_92 = arith.constant 0.000000e+00 : f32
    %231 = vector.broadcast %cst_92 : f32 to vector<16x64xf32>
    %232 = arith.maximumf %230, %231 : vector<16x64xf32>
    %233 = arith.truncf %232 : vector<16x64xf32> to vector<16x64xbf16>
    %c1_93 = arith.constant 1 : index
    %c0_94 = arith.constant 0 : index
    %c0_95 = arith.constant 0 : index
    %234 = vector.load %arg11[%c1_93, %c0_94, %c0_95] : memref<2x64x32xbf16, #tpu.memory_space<vmem>>, vector<1x64x32xbf16>
    %235 = vector.shape_cast %234 : vector<1x64x32xbf16> to vector<64x32xbf16>
    %cst_96 = arith.constant dense<0.000000e+00> : vector<16x32xf32>
    %236 = tpu.matmul %233, %235, %cst_96 {dimension_numbers = #tpu.dot_dimension_numbers<[1], [0], [0], [1], [0, 0, 1, 1], [], []>} : vector<16x64xbf16>, vector<64x32xbf16>, vector<16x32xf32> -> vector<16x32xf32>
    %237 = vector.extract_strided_slice %190 {offsets = [3, 0], sizes = [1, 32], strides = [1, 1]} : vector<6x32xf32> to vector<1x32xf32>
    %238 = vector.broadcast %237 : vector<1x32xf32> to vector<16x32xf32>
    %239 = arith.addf %236, %238 : vector<16x32xf32>
    %240 = arith.addf %239, %222 : vector<16x32xf32>
    %241 = vector.extract_strided_slice %190 {offsets = [4, 0], sizes = [1, 32], strides = [1, 1]} : vector<6x32xf32> to vector<1x32xf32>
    %242 = vector.extract_strided_slice %190 {offsets = [5, 0], sizes = [1, 32], strides = [1, 1]} : vector<6x32xf32> to vector<1x32xf32>
    %cst_97 = arith.constant dense<0.000000e+00> : vector<16xf32>
    %243 = vector.multi_reduction <add>, %240, %cst_97 [1] : vector<16x32xf32> to vector<16xf32>
    %244 = vector.shape_cast %243 : vector<16xf32> to vector<16x1xf32>
    %cst_98 = arith.constant 3.200000e+01 : f32
    %245 = vector.broadcast %cst_98 : f32 to vector<16x1xf32>
    %246 = arith.divf %244, %245 : vector<16x1xf32>
    %247 = vector.broadcast %246 : vector<16x1xf32> to vector<16x32xf32>
    %248 = arith.subf %240, %247 : vector<16x32xf32>
    %249 = arith.mulf %248, %248 : vector<16x32xf32>
    %cst_99 = arith.constant dense<0.000000e+00> : vector<16xf32>
    %250 = vector.multi_reduction <add>, %249, %cst_99 [1] : vector<16x32xf32> to vector<16xf32>
    %251 = vector.shape_cast %250 : vector<16xf32> to vector<16x1xf32>
    %cst_100 = arith.constant 3.200000e+01 : f32
    %252 = vector.broadcast %cst_100 : f32 to vector<16x1xf32>
    %253 = arith.divf %251, %252 : vector<16x1xf32>
    %254 = vector.broadcast %246 : vector<16x1xf32> to vector<16x32xf32>
    %255 = arith.subf %240, %254 : vector<16x32xf32>
    %cst_101 = arith.constant 9.99999974E-6 : f32
    %256 = vector.broadcast %cst_101 : f32 to vector<16x1xf32>
    %257 = arith.addf %253, %256 : vector<16x1xf32>
    %258 = math.rsqrt %257 : vector<16x1xf32>
    %259 = vector.broadcast %258 : vector<16x1xf32> to vector<16x32xf32>
    %260 = arith.mulf %255, %259 : vector<16x32xf32>
    %261 = vector.broadcast %241 : vector<1x32xf32> to vector<16x32xf32>
    %262 = arith.mulf %260, %261 : vector<16x32xf32>
    %263 = vector.broadcast %242 : vector<1x32xf32> to vector<16x32xf32>
    %264 = arith.addf %262, %263 : vector<16x32xf32>
    %265 = arith.truncf %264 : vector<16x32xf32> to vector<16x32xbf16>
    %c0_102 = arith.constant 0 : index
    %c0_103 = arith.constant 0 : index
    %266 = vector.load %arg12[%c0_102, %c0_103] : memref<32x8xbf16, #tpu.memory_space<vmem>>, vector<32x8xbf16>
    %cst_104 = arith.constant dense<0.000000e+00> : vector<16x8xf32>
    %267 = tpu.matmul %265, %266, %cst_104 {dimension_numbers = #tpu.dot_dimension_numbers<[1], [0], [0], [1], [0, 0, 1, 1], [], []>} : vector<16x32xbf16>, vector<32x8xbf16>, vector<16x8xf32> -> vector<16x8xf32>
    %c0_105 = arith.constant 0 : index
    %c0_106 = arith.constant 0 : index
    %268 = vector.load %arg13[%c0_105, %c0_106] : memref<1x8xf32, #tpu.memory_space<vmem>>, vector<1x8xf32>
    %269 = vector.broadcast %268 : vector<1x8xf32> to vector<16x8xf32>
    %270 = arith.addf %267, %269 : vector<16x8xf32>
    %c0_107 = arith.constant 0 : index
    %c0_108 = arith.constant 0 : index
    %271 = vector.load %arg16[%c0_107, %c0_108] : memref<16x8xf32, #tpu.memory_space<vmem>>, vector<16x8xf32>
    tpu.vector_store %arg16[%c0_107, %c0_108], %270 {strides = array<i32>} : memref<16x8xf32, #tpu.memory_space<vmem>>, vector<16x8xf32>,
    return
  }
}

</mosaic_0001>

<bundles_post_ra>
// kernel: attn_module_forward.1
= control target key start
LH: loop header
LB: loop body
LE: loop exit
PB: predicated region body
PF: predicated region fallthrough
CT: control target
= control target key end

     0   :  { %s2647_s0 = inlined_call_operand.hbm [shape: f32[16,16], index: 0, kind: input, shape index: {}]   ;;  %s2648_s1 = inlined_call_operand.hbm [shape: bf16[16,132], index: 1, kind: input, shape index: {}]   ;;  %s2649_s2 = inlined_call_operand.hbm [shape: f32[2,4], index: 2, kind: input, shape index: {}]   ;;  %s2650_s3 = inlined_call_operand.vmem [shape: bf16[2,4,32], index: 3, kind: input, shape index: {}]   ;;  %s2651_s4 = inlined_call_operand.vmem [shape: f32[1,32], index: 4, kind: input, shape index: {}]   ;;  %s2652_s5 = inlined_call_operand.vmem [shape: bf16[2,32,96], index: 5, kind: input, shape index: {}]   ;;  %s2653_s6 = inlined_call_operand.vmem [shape: f32[2,1,96], index: 6, kind: input, shape index: {}]   ;;  %s2654_s7 = inlined_call_operand.vmem [shape: bf16[2,32,32], index: 7, kind: input, shape index: {}]   ;;  %s2655_s8 = inlined_call_operand.vmem [shape: f32[2,6,32], index: 8, kind: input, shape index: {}]   ;;  %s2656_s9 = inlined_call_operand.vmem [shape: bf16[2,32,64], index: 9, kind: input, shape index: {}]   ;;  %s2657_s10 = inlined_call_operand.hbm [shape: f32[2,1,64], index: 10, kind: input, shape index: {}]   ;;  %s2658_s11 = inlined_call_operand.vmem [shape: bf16[2,64,32], index: 11, kind: input, shape index: {}]   ;;  %s2659_s12 = inlined_call_operand.vmem [shape: bf16[32,8], index: 12, kind: input, shape index: {}]   ;;  %s2660_s13 = inlined_call_operand.vmem [shape: f32[1,8], index: 13, kind: input, shape index: {}]   ;;  %s2661_s14 = inlined_call_operand.vmem [shape: f32[32,32], index: 14, kind: input, shape index: {}]   ;;  %s2662_s15 = inlined_call_operand.hbm [shape: f32[32,32], index: 15, kind: input, shape index: {}]   ;;  %s2663_s16 = inlined_call_operand.hbm [shape: f32[16,8], index: 16, kind: output, shape index: {}]  }
   0x1   :  { %2670 = sst [smem:[#allocation16_spill]] %s2647_s0 }
   0x2   :  { %2671 = sst [smem:[#allocation17_spill]] %s2663_s16 }
   0x3   :  { %21 = vsyncpa [#allocation3], 0 }
   0x4   :  { %22 = vsyncpa [#allocation6], 0 }
   0x5   :  { %23 = vsyncpa [#allocation9], 0 }
   0x6   :  { %24 = vsyncpa [#allocation4], 0  ;;  %s2067_s21 = smov [#allocation5]   ;;  %s2068_s23 = smov [#allocation8]  }
   0x7   :  { %s42_s22 = sshll.u32 %s2067_s21, 4  ;;  %s78_s24 = sshll.u32 %s2068_s23, 4  ;;  %s43_s22 = int_to_ptr.vmem [resolvable:$true] %s42_s22  ;;  %s2169_s24 = int_to_ptr.vmem [resolvable:$true] %s78_s24 }
   0x8   :  { %s1927_s27 = scalar_lea.hbm %s2648_s1, 256 }
   0x9   :  { %p1928_p0 = scmp.ne.s32.totalorder %s2648_s1, %s1927_s27  ;;  %p1931_p1 = scmp.lt.u32.totalorder %s1927_s27, %s2648_s1 }
   0xb   :  { %p1933_p2 = pnand %p1931_p1, %p1928_p0 }
   0xd   :  { %1936 = shalt.err (!%p1933_p2)
}
   0xe   :  { %s1937_s17 = scalar_lea.vmem %s43_s22, 256  ;;  %p1942_p4 = scmp.lt.s32.totalorder %s43_s22, %s43_s22 }
   0xf   :  { %p1938_p3 = scmp.ne.s32.totalorder %s43_s22, %s1937_s17  ;;  %p1943_p5 = scmp.lt.s32.totalorder %s1937_s17, %s1937_s17 }
  0x11   :  { %p1944_p6 = por %p1943_p5, %p1942_p4 }
  0x13   :  { %p1945_p7 = pnand %p1944_p6, %p1938_p3 }
  0x15   :  { %1948 = shalt.err (!%p1945_p7)
}
  0x16   :  { %s2665_s18 = smov 128   ;;  %s2667_s19 = smov 8  }
  0x17   :  { %48 = dma.hbm_to_vmem [thread:$0]  %s2648_s1, 256, %s43_s22, [#allocation6], %s2665_s18, %s2665_s18, %s2667_s19  }
  0x18   :  { %s1949_s26 = scalar_lea.hbm %s2657_s10, 32 }
  0x19   :  { %p1950_p8 = scmp.ne.s32.totalorder %s2657_s10, %s1949_s26  ;;  %p1953_p9 = scmp.lt.u32.totalorder %s1949_s26, %s2657_s10 }
  0x1b   :  { %p1955_p10 = pnand %p1953_p9, %p1950_p8 }
  0x1d   :  { %1958 = shalt.err (!%p1955_p10)
}
  0x1e   :  { %s1959_s0 = scalar_lea.vmem %s2169_s24, 32  ;;  %p1964_p12 = scmp.lt.s32.totalorder %s2169_s24, %s2169_s24 }
  0x1f   :  { %p1960_p11 = scmp.ne.s32.totalorder %s2169_s24, %s1959_s0  ;;  %p1965_p13 = scmp.lt.s32.totalorder %s1959_s0, %s1959_s0 }
  0x21   :  { %p1966_p0 = por %p1965_p13, %p1964_p12 }
  0x23   :  { %p1967_p1 = pnand %p1966_p0, %p1960_p11 }
  0x25   :  { %1970 = shalt.err (!%p1967_p1)
}
  0x26   :  { %s2071_s1 = smov 16   ;;  %s2072_s22 = smov 1  }
  0x27   :  { %84 = dma.hbm_to_vmem [thread:$0]  %s2657_s10, 32, %s2169_s24, [#allocation9], %s2071_s1, %s2071_s1, %s2072_s22  }
  0x28   :  { %s2073_s21 = smov [#allocation2]   ;;  %s2074_s25 = smov [#allocation7]  }
  0x29   :  { %s30_s23 = sshll.u32 %s2073_s21, 4  ;;  %s55_s26 = sshll.u32 %s2074_s25, 4  ;;  %s31_s23 = int_to_ptr.vmem [resolvable:$true] %s30_s23  ;;  %s56_s26 = int_to_ptr.vmem [resolvable:$true] %s55_s26 }
  0x2a   :  { %s2672_s29 = sld [smem:[#allocation16_spill]] }
  0x30   :  { %s1971_s30 = scalar_lea.hbm %s2672_s29, 256 }
  0x31   :  { %p1972_p2 = scmp.ne.s32.totalorder %s2672_s29, %s1971_s30  ;;  %p1975_p3 = scmp.lt.u32.totalorder %s1971_s30, %s2672_s29 }
  0x33   :  { %p1977_p4 = pnand %p1975_p3, %p1972_p2 }
  0x35   :  { %1980 = shalt.err (!%p1977_p4)
}
  0x36   :  { %s1981_s10 = scalar_lea.vmem %s31_s23, 256  ;;  %p1986_p6 = scmp.lt.s32.totalorder %s31_s23, %s31_s23 }
  0x37   :  { %p1982_p5 = scmp.ne.s32.totalorder %s31_s23, %s1981_s10  ;;  %p1987_p7 = scmp.lt.s32.totalorder %s1981_s10, %s1981_s10 }
  0x39   :  { %p1988_p8 = por %p1987_p7, %p1986_p6 }
  0x3b   :  { %p1989_p9 = pnand %p1988_p8, %p1982_p5 }
  0x3d   :  { %1992 = shalt.err (!%p1989_p9)
}
  0x3e   :  { %s2673_s24 = smov 8   ;;  %s2674_s22 = smov 128  }
  0x3f   :  { %36 = dma.hbm_to_vmem [thread:$0]  %s2672_s29, 256, %s31_s23, [#allocation3], %s2674_s22, %s2674_s22, %s2673_s24  }
  0x40   :  { %s1993_s16 = scalar_lea.hbm %s2649_s2, 32 }
  0x41   :  { %p1994_p10 = scmp.ne.s32.totalorder %s2649_s2, %s1993_s16  ;;  %p1997_p11 = scmp.lt.u32.totalorder %s1993_s16, %s2649_s2 }
  0x43   :  { %p1999_p12 = pnand %p1997_p11, %p1994_p10 }
  0x45   :  { %2002 = shalt.err (!%p1999_p12)
}
  0x46   :  { %s2003_s30 = scalar_lea.vmem %s56_s26, 32  ;;  %p2008_p0 = scmp.lt.s32.totalorder %s56_s26, %s56_s26 }
  0x47   :  { %p2004_p13 = scmp.ne.s32.totalorder %s56_s26, %s2003_s30  ;;  %p2009_p1 = scmp.lt.s32.totalorder %s2003_s30, %s2003_s30 }
  0x49   :  { %p2010_p2 = por %p2009_p1, %p2008_p0 }
  0x4b   :  { %p2011_p3 = pnand %p2010_p2, %p2004_p13 }
  0x4d   :  { %2014 = shalt.err (!%p2011_p3)
}
  0x4e   :  { %58 = dma.hbm_to_vmem [thread:$0]  %s2649_s2, 32, %s56_s26, [#allocation6]  }
  0x4f   :  { %s2075_s0 = smov [#allocation10]   ;;  %s2015_s18 = scalar_lea.hbm %s2662_s15, 512 }
  0x50   :  { %s98_s10 = sshll.u32 %s2075_s0, 4  ;;  %p2016_p4 = scmp.ne.s32.totalorder %s2662_s15, %s2015_s18  ;;  %s99_s10 = int_to_ptr.vmem [resolvable:$true] %s98_s10 }
  0x51   :  { %p2019_p5 = scmp.lt.u32.totalorder %s2015_s18, %s2662_s15 }
  0x53   :  { %p2021_p6 = pnand %p2019_p5, %p2016_p4 }
  0x55   :  { %2024 = shalt.err (!%p2021_p6)
}
  0x56   :  { %s2025_s27 = scalar_lea.vmem %s99_s10, 512  ;;  %p2030_p8 = scmp.lt.s32.totalorder %s99_s10, %s99_s10 }
  0x57   :  { %p2026_p7 = scmp.ne.s32.totalorder %s99_s10, %s2025_s27  ;;  %p2031_p9 = scmp.lt.s32.totalorder %s2025_s27, %s2025_s27 }
  0x59   :  { %p2032_p10 = por %p2031_p9, %p2030_p8 }
  0x5b   :  { %p2033_p11 = pnand %p2032_p10, %p2026_p7 }
  0x5d   :  { %2036 = shalt.err (!%p2033_p11)
}
  0x5e   :  { %104 = dma.hbm_to_vmem [thread:$0]  %s2662_s15, 512, %s99_s10, [#allocation9], %s2674_s22, %s2674_s22, %s2673_s24  }
  0x5f   :  { %2059 = dma.done.wait [#allocation3], 256  }
  0x60   :  { %2060 = vsyncadd [#allocation3], 4294967040 }
  0x61   :  { %2061 = dma.done.wait [#allocation6], 288  }
  0x62   :  { %2062 = vsyncadd [#allocation6], 4294967008 }
  0x63   :  { %2063 = dma.done.wait [#allocation9], 544  }
  0x64   :  { %2064 = vsyncadd [#allocation9], 4294966752  ;;  %v2076_v0 = vmov 0   ;;  %v1854_v1 = vld [vmem:[#allocation5 + $0x4] ss:$8 sps:$4 sm:$0xff]   ;;  %v121_v3 = vld [vmem:[#allocation2] sm:$0xff] }
  0x65   :  { %172 = vmatprep.mubr.bf16.mxu0 %v2076_v0  ;;  %v1856_v2 = vld [vmem:[#allocation5] ss:$8 sps:$4 sm:$0xff]   ;;  %v122_v4 = vld [vmem:[#allocation2 + $0x8] sm:$0xff]  ;;  %vm136_vm0 = vcmask 130048   ;;  %140 = vmatprep.subr.bf16.mxu0 %v1854_v1  ;;  %v1588_v6 = vld [vmem:[%s2650_s3 + $0x2] sm:$0x3] }
  0x66   :  { %v123_v5 = vpack.c.bf16 %v122_v4, %v121_v3  ;;  %141 = vmatpush1.bf16.msra.mxu0 %v1856_v2  ;;  %vm240_vm1 = vcmask 1041408   ;;  %v2077_v7 = vmov 0.0   ;;  %v232_v9 = vld [vmem:[%s2650_s3] sm:$0x3]  ;;  %vm2078_vm2 = vmmov 0   ;;  %s2079_s29 = smov 64  }
  0x67   :  { %1709 = vmatprep.subr.bf16.mxu1 %v2077_v7  ;;  %v242_v8 = vsel %vm240_vm1, %v1588_v6, 0  ;;  %1715 = vmatprep.subr.bf16.mxu0 %v2077_v7  ;;  %v289_v10 = vsel %vm240_vm1, %v232_v9, 0  ;;  %v1587_v11 = vld [vmem:[#allocation7 + $0x1] ss:$0 sm:$0xff]  ;;  %vm236_vm3 = vcmask 31744   ;;  %s2080_s3 = smov 32  }
  0x68   :  { %1710 = vmatpush3.bf16.msra.mxu1 %v242_v8  ;;  %1711 = vmatprep.mubr.msk.bf16.mxu1 %vm2078_vm2, %v2077_v7  ;;  %s2081_s0 = smov 4   ;;  %v1586_v43 = vld [vmem:[#allocation7] ss:$0 sm:$0xff]  ;;  %v1858_v52 = vld [vmem:[%s2652_s5 + $0x8] sm:$0xff]   ;;  %v2296_v55 = vld [vmem:[%s2661_s14 + $0x10] sm:$0xff]  ;;  %vm373_vm4 = vcmask 261120  }
  0x69   :  { %1585 = vmatmul.mubr.msk.bf16.vlgmr.msra.gmra.mrb[0].mxu0 %vm136_vm0, %v123_v5  ;;  %1721 = vmatprep.subr.bf16.mxu1 %v2077_v7  ;;  %v1857_v51 = vld [vmem:[%s2652_s5] sm:$0xff]   ;;  %v2287_v54 = vld [vmem:[%s2661_s14 + $0x8] sm:$0xff]  ;;  %v2301_v56 = vld [vmem:[%s2661_s14 + $0x18] sm:$0xff]  ;;  %vm848_vm5 = vcmask 523264   ;;  %vm1561_vm6 = vcmask 64512  }
  0x6a   :  { %1717 = vmatprep.mubr.msk.bf16.mxu0 %vm2078_vm2, %v2077_v7  ;;  %1716 = vmatpush3.bf16.msra.mxu0 %v289_v10  ;;  %v2282_v53 = vld [vmem:[%s2661_s14] sm:$0xff] }
  0x6b   :  { %v1591_v60 = vld [vmem:[%s2651_s4] ss:$0 sm:$0xff]  ;;  %s2082_s4 = smov 96  }
  0x6c   :  { %v1592_v5 = vld [vmem:[%s2653_s6] ss:$0 sm:$0xff] }
 0x13c   :  { %v174_v12 = vpop.f32.mrb[0].mxu0 }
 0x13d   :  { %183 = vrot.lane.b32.xlu0 %v174_v12, %s2079_s29  ;;  %v176_v13 = vpop.f32.mrb[1].mxu0 }
 0x13e   :  { %v227_v14 = vadd.f32 %v1587_v11, %v176_v13  ;;  %v178_v15 = vpop.f32.mrb[2].mxu0 }
 0x13f   :  { %v180_v16 = vpop.f32.mrb[3].mxu0 }
 0x140   :  { %v228_v17 = vadd.f32 %v1587_v11, %v180_v16  ;;  %v229_v18 = vmax.f32 %v227_v14, 0.0 }
 0x141   :  { %185 = vrot.lane.b32.xlu0 %v178_v15, %s2079_s29 }
 0x142   :  { %v230_v19 = vmax.f32 %v228_v17, 0.0 }
 0x144   :  { %v233_v20 = vpack.c.bf16 %v230_v19, %v229_v18 }
 0x146   :  { %1712 = vmatmul.mubr.msk.bf16.vlgmr.msra.gmra.mrb[0].mxu1 %vm236_vm3, %v233_v20 }
 0x147   :  { %1725 = vmatprep.mubr.msk.bf16.mxu1 %vm2078_vm2, %v2077_v7  ;;  %1722 = vmatpush3.bf16.msra.mxu1 %v1857_v51 }
 0x148   :  { %1723 = vmatprep.subr.bf16.mxu1 %v2077_v7 }
 0x14b   :  { %1724 = vmatpush3.bf16.msra.mxu1 %v1858_v52 }
 0x1af   :  { %v184_v21 = vpop.permute.xlu0 %183 }
 0x1b0   :  { %v187_v22 = vmax.f32 %v174_v12, %v184_v21 }
 0x1b2   :  { %189 = vrot.lane.b32.xlu1 %v187_v22, %s2080_s3 }
 0x1b3   :  { %v186_v23 = vpop.permute.xlu0 %185 }
 0x1b4   :  { %v188_v24 = vmax.f32 %v178_v15, %v186_v23 }
 0x1b6   :  { %191 = vrot.lane.b32.xlu1 %v188_v24, %s2080_s3 }
 0x219   :  { %v278_v25 = vpop.f32.mrb[0].mxu1 }
 0x21a   :  { %v1713_v26 = vpop.f32.mrb[1].mxu1 }
 0x21b   :  { %v281_v27 = vpop.f32.mrb[2].mxu1  ;;  %v2353_v26 = vld [vmem:[#allocation10] sm:$0xff] }
 0x21c   :  { %v1714_v28 = vpop.f32.mrb[3].mxu1 }
 0x21d   :  { %v2355_v28 = vld [vmem:[#allocation10 + $0x10] sm:$0xff] }
 0x224   :  { %v190_v29 = vpop.permute.xlu1 %189 }
 0x225   :  { %v193_v30 = vmax.f32 %v187_v22, %v190_v29 }
 0x227   :  { %195 = vrot.lane.b32.xlu0 %v193_v30, %s2071_s1 }
 0x228   :  { %v192_v31 = vpop.permute.xlu1 %191 }
 0x229   :  { %v194_v32 = vmax.f32 %v188_v24, %v192_v31 }
 0x22b   :  { %197 = vrot.lane.b32.xlu1 %v194_v32, %s2071_s1 }
 0x299   :  { %v196_v33 = vpop.permute.xlu0 %195 }
 0x29a   :  { %v199_v34 = vmax.f32 %v193_v30, %v196_v33  ;;  %v2357_v30 = vld [vmem:[#allocation10 + $0x8] sm:$0xff] }
 0x29c   :  { %201 = vrot.lane.b32.xlu0 %v199_v34, %s2673_s24 }
 0x29d   :  { %v198_v35 = vpop.permute.xlu1 %197 }
 0x29e   :  { %v200_v36 = vmax.f32 %v194_v32, %v198_v35 }
 0x2a0   :  { %203 = vrot.lane.b32.xlu1 %v200_v36, %s2673_s24 }
 0x30e   :  { %v202_v37 = vpop.permute.xlu0 %201 }
 0x30f   :  { %v205_v38 = vmax.f32 %v199_v34, %v202_v37  ;;  %v2363_v37 = vld [vmem:[#allocation10 + $0x18] sm:$0xff] }
 0x311   :  { %207 = vrot.lane.b32.xlu0 %v205_v38, %s2081_s0 }
 0x312   :  { %v204_v39 = vpop.permute.xlu1 %203 }
 0x313   :  { %v206_v40 = vmax.f32 %v200_v36, %v204_v39 }
 0x315   :  { %209 = vrot.lane.b32.xlu1 %v206_v40, %s2081_s0  ;;  %423 = vrot.lane.b32.xlu0 %v2282_v53, %s2080_s3 }
 0x319   :  { %425 = vrot.lane.b32.xlu1 %v2287_v54, %s2080_s3  ;;  %427 = vrot.lane.b32.xlu0 %v2296_v55, %s2080_s3 }
 0x31d   :  { %429 = vrot.lane.b32.xlu1 %v2301_v56, %s2080_s3  ;;  %s2083_s3 = smov [#allocation11]  }
 0x31e   :  { %s1569_s0 = sshll.u32 %s2083_s3, 4  ;;  %s1570_s0 = int_to_ptr.vmem [resolvable:$true] %s1569_s0 }
 0x31f   :  { %p2042_p13 = scmp.lt.s32.totalorder %s1570_s0, %s1570_s0 }
 0x383   :  { %v208_v41 = vpop.permute.xlu0 %207 }
 0x384   :  { %v211_v42 = vmax.f32 %v205_v38, %v208_v41 }
 0x386   :  { %v218_v45 = vadd.f32 %v1586_v43, %v211_v42 }
 0x387   :  { %v210_v44 = vpop.permute.xlu1 %209  ;;  %v2317_v3 = vpop.permute.xlu0 %423 }
 0x388   :  { %v212_v46 = vmax.f32 %v206_v40, %v210_v44  ;;  %v220_v48 = vmax.f32 %v218_v45, 0.0 }
 0x38a   :  { %v219_v47 = vadd.f32 %v1586_v43, %v212_v46 }
 0x38b   :  { %v2319_v4 = vpop.permute.xlu1 %425  ;;  %v2326_v10 = vpop.permute.xlu0 %427 }
 0x38c   :  { %v221_v49 = vmax.f32 %v219_v47, 0.0 }
 0x38e   :  { %v231_v50 = vpack.c.bf16 %v221_v49, %v220_v48 }
 0x38f   :  { %v2328_v12 = vpop.permute.xlu1 %429 }
 0x390   :  { %1718 = vmatmul.mubr.msk.bf16.vlgmr.msra.gmra.mrb[4].mxu0 %vm236_vm3, %v231_v50 }
 0x463   :  { %v325_v57 = vpop.f32.mrb[4].mxu0 }
 0x464   :  { %v326_v58 = vadd.f32 %v325_v57, %v278_v25  ;;  %v1719_v59 = vpop.f32.mrb[5].mxu0 }
 0x465   :  { %v328_v61 = vpop.f32.mrb[6].mxu0 }
 0x466   :  { %v329_v62 = vadd.f32 %v328_v61, %v281_v27  ;;  %v1720_v63 = vpop.f32.mrb[7].mxu0  ;;  %v2310_v0 = vadd.f32 %v1591_v60, %v326_v58 }
 0x468   :  { %v2312_v1 = vadd.f32 %v1591_v60, %v329_v62 }
 0x46a   :  { %v349_v2 = vpack.c.bf16 %v2312_v1, %v2310_v0 }
 0x46c   :  { %1726 = vmatmul.mubr.msk.bf16.vlgmr.msra.gmra.mrb[4].mxu1 %vm373_vm4, %v349_v2 }
 0x53f   :  { %v411_v6 = vpop.f32.mrb[4].mxu1 }
 0x540   :  { %v2324_v8 = vadd.f32 %v1592_v5, %v411_v6  ;;  %v1727_v9 = vpop.f32.mrb[5].mxu1 }
 0x541   :  { %v414_v11 = vpop.f32.mrb[6].mxu1 }
 0x542   :  { %v2330_v13 = vadd.f32 %v1592_v5, %v414_v11  ;;  %v1728_v14 = vpop.f32.mrb[7].mxu1  ;;  %v437_v15 = vmul.f32 %v2326_v10, %v2324_v8  ;;  %v435_v18 = vmul.f32 %v2317_v3, %v2324_v8 }
 0x544   :  { %v438_v16 = vmul.f32 %v2328_v12, %v2330_v13  ;;  %v418_v17 = vpack.c.bf16 %v2330_v13, %v2324_v8  ;;  %v436_v19 = vmul.f32 %v2319_v4, %v2330_v13 }
 0x546   :  { %v440_v20 = vpack.c.bf16 %v438_v16, %v437_v15  ;;  %1733 = vmatprep.mubr.msk.bf16.mxu0 %vm373_vm4, %v418_v17  ;;  %v439_v21 = vpack.c.bf16 %v436_v19, %v435_v18 }
 0x548   :  { %463 = vrot.lane.b32.xlu1 %v440_v20, %s2082_s4  ;;  %461 = vrot.lane.b32.xlu0 %v439_v21, %s2082_s4 }
 0x5ba   :  { %v462_v22 = vpop.permute.xlu0 %461  ;;  %v464_v24 = vpop.permute.xlu1 %463 }
 0x5bb   :  { %v469_v23 = vsel %vm373_vm4, %v462_v22, 0  ;;  %1833 = vmatprep.subr.msk.bf16.mxu0 %vm373_vm4, %v462_v22  ;;  %v472_v25 = vsel %vm373_vm4, %v464_v24, 0 }
 0x5bc   :  { %1730 = vmatpush3.bf16.xpose.msra.mxu0 %v469_v23 }
 0x5bd   :  { %1834 = vmatprep.subr.msk.bf16.mxu0 %vm373_vm4, %v464_v24 }
 0x5c4   :  { %1732 = vmatpush3.bf16.xpose.msra.mxu0 %v472_v25 }
 0x5c5   :  { %1753 = vmatprep.subr.bf16.mxu0 %v2077_v7 }
 0x5cb   :  { %1734 = vmatmul.mubr.msk.bf16.vlgmr.msra.gmra.mrb[8].mxu0 %vm373_vm4, %v418_v17 }
 0x5cc   :  { %1757 = vmatprep.mubr.msk.bf16.mxu0 %vm2078_vm2, %v2077_v7 }
 0x69e   :  { %v1735_v27 = vpop.f32.mrb[8].mxu0 }
 0x69f   :  { %v508_v29 = vpop.f32.mrb[9].mxu0  ;;  %v517_v34 = vadd.f32 %v1735_v27, %v2355_v28 }
 0x6a0   :  { %v509_v31 = vadd.f32 %v508_v29, %v2353_v26  ;;  %v1736_v32 = vpop.f32.mrb[10].mxu0 }
 0x6a1   :  { %v511_v33 = vpop.f32.mrb[11].mxu0  ;;  %v520_v39 = vadd.f32 %v1736_v32, %v2363_v37  ;;  %v529_v40 = vsel %vm373_vm4, %v517_v34, -inf }
 0x6a2   :  { %v512_v35 = vadd.f32 %v511_v33, %v2357_v30  ;;  %v523_v36 = vsel %vm373_vm4, %v509_v31, -inf }
 0x6a3   :  { %524 = vmax.xlane.f32.xlu0 %v523_v36  ;;  %v532_v41 = vsel %vm373_vm4, %v520_v39, -inf }
 0x6a4   :  { %v526_v38 = vsel %vm373_vm4, %v512_v35, -inf }
 0x6a5   :  { %527 = vmax.xlane.f32.xlu1 %v526_v38 }
 0x6a7   :  { %530 = vmax.xlane.f32.xlu0 %v529_v40 }
 0x6ab   :  { %533 = vmax.xlane.f32.xlu0 %v532_v41 }
 0x6b6   :  { %441 = vrot.lane.b32.xlu1 %v2282_v53, %s2079_s29 }
 0x6ba   :  { %445 = vrot.lane.b32.xlu1 %v2296_v55, %s2079_s29 }
 0x6be   :  { %447 = vrot.lane.b32.xlu1 %v2301_v56, %s2079_s29 }
 0x6c1   :  { %443 = vrot.lane.b32.xlu0 %v2287_v54, %s2079_s29 }
 0x730   :  { %v525_v42 = vpop.xlane.xlu0 %524 }
 0x731   :  { %v535_v44 = vsub.f32 %v509_v31, %v525_v42 }
 0x732   :  { %v528_v43 = vpop.xlane.xlu1 %527 }
 0x733   :  { %v536_v45 = vsub.f32 %v512_v35, %v528_v43  ;;  %v539_v49 = vmul.f32 1.442695, %v535_v44  ;;  %v1860_v35 = vld [vmem:[%s2654_s7 + $0x8] sm:$0xff]   ;;  %v640_v44 = vlaneseq }
 0x734   :  { %v531_v46 = vpop.xlane.xlu0 %530 }
 0x735   :  { %v541_v47 = vmul.f32 1.442695, %v536_v45  ;;  %v537_v48 = vsub.f32 %v517_v34, %v531_v46  ;;  %v1859_v34 = vld [vmem:[%s2654_s7] sm:$0xff]   ;;  %v2415_v45 = vshrl.u32 %v640_v44, 7 }
 0x736   :  { %v2383_v63 = vpop.permute.xlu1 %441 }
 0x737   :  { %1879 = vpow2.f32 %v541_v47  ;;  %v543_v50 = vmul.f32 1.442695, %v537_v48  ;;  %v453_v5 = vmul.f32 %v2383_v63, %v2324_v8  ;;  %v642_v46 = vsub.s32 0, %v2415_v45  ;;  %v2421_v47 = vld [vmem:[%s2655_s8] sm:$0x3f] }
 0x738   :  { %v534_v51 = vpop.xlane.xlu0 %533 }
 0x739   :  { %1881 = vpow2.f32 %v543_v50  ;;  %v538_v52 = vsub.f32 %v520_v39, %v534_v51  ;;  %v643_v48 = vrot.slane %v2421_v47, %v642_v46 }
 0x73a   :  { %1883 = vpow2.f32 %v539_v49  ;;  %v2389_v9 = vpop.permute.xlu1 %445 }
 0x73b   :  { %v545_v53 = vmul.f32 1.442695, %v538_v52  ;;  %v455_v15 = vmul.f32 %v2389_v9, %v2324_v8 }
 0x73c   :  { %v2380_v61 = vpop.permute.xlu0 %443 }
 0x73d   :  { %1885 = vpow2.f32 %v545_v53  ;;  %v454_v2 = vmul.f32 %v2380_v61, %v2330_v13 }
 0x73e   :  { %v2392_v11 = vpop.permute.xlu1 %447 }
 0x73f   :  { %v457_v6 = vpack.c.bf16 %v454_v2, %v453_v5  ;;  %v456_v14 = vmul.f32 %v2392_v11, %v2330_v13 }
 0x741   :  { %v1880_v55 = vpop.eup %1879  ;;  %v458_v16 = vpack.c.bf16 %v456_v14, %v455_v15 }
 0x742   :  { %v550_v56 = vsel %vm373_vm4, %v1880_v55, 0.0 }
 0x743   :  { %v1882_v54 = vpop.eup %1881  ;;  %551 = vadd.xlane.f32.xlu1 %v550_v56 }
 0x744   :  { %v553_v57 = vsel %vm373_vm4, %v1882_v54, 0.0  ;;  %v1884_v58 = vpop.eup %1883 }
 0x745   :  { %554 = vadd.xlane.f32.xlu0 %v553_v57  ;;  %v547_v59 = vsel %vm373_vm4, %v1884_v58, 0.0 }
 0x747   :  { %v1886_v60 = vpop.eup %1885 }
 0x748   :  { %v556_v62 = vsel %vm373_vm4, %v1886_v60, 0.0 }
 0x749   :  { %548 = vadd.xlane.f32.xlu0 %v547_v59 }
 0x74d   :  { %557 = vadd.xlane.f32.xlu0 %v556_v62 }
 0x754   :  { %571 = vrot.lane.b32.xlu1 %v457_v6, %s2079_s29 }
 0x763   :  { %573 = vrot.lane.b32.xlu0 %v458_v16, %s2079_s29 }
 0x7d0   :  { %v552_v17 = vpop.xlane.xlu1 %551 }
 0x7d1   :  { %1887 = vrcp.f32 %v552_v17  ;;  %v1862_v17 = vld [vmem:[%s2656_s9 + $0x8] sm:$0xff]  }
 0x7d2   :  { %v555_v18 = vpop.xlane.xlu0 %554 }
 0x7d4   :  { %v572_v19 = vpop.permute.xlu1 %571 }
 0x7d5   :  { %1737 = vmatprep.subr.bf16.mxu1 %v572_v19 }
 0x7d6   :  { %1738 = vmatpush3.bf16.msra.mxu1 %v572_v19  ;;  %v549_v20 = vpop.xlane.xlu0 %548  ;;  %v1864_v19 = vld [vmem:[%s2658_s11 + $0x8] sm:$0xff]  }
 0x7d7   :  { %1889 = vrcp.f32 %v549_v20 }
 0x7d8   :  { %1891 = vrcp.f32 %v555_v18  ;;  %v1863_v18 = vld [vmem:[%s2658_s11] sm:$0xff]  }
 0x7da   :  { %v558_v21 = vpop.xlane.xlu0 %557 }
 0x7db   :  { %1893 = vrcp.f32 %v558_v21  ;;  %v1888_v23 = vpop.eup %1887 }
 0x7dc   :  { %v564_v24 = vmul.f32 %v1888_v23, %v1880_v55 }
 0x7de   :  { %v574_v22 = vpop.permute.xlu0 %573 }
 0x7df   :  { %1739 = vmatprep.subr.bf16.mxu1 %v574_v22 }
 0x7e0   :  { %1740 = vmatpush3.bf16.msra.mxu1 %v574_v22 }
 0x7e1   :  { %v1890_v13 = vpop.eup %1889  ;;  %1745 = vmatprep.subr.bf16.mxu1 %v2077_v7 }
 0x7e2   :  { %v563_v8 = vmul.f32 %v1890_v13, %v1884_v58  ;;  %v1892_v25 = vpop.eup %1891 }
 0x7e3   :  { %v565_v31 = vmul.f32 %v1892_v25, %v1882_v54 }
 0x7e4   :  { %v567_v27 = vpack.c.bf16 %v564_v24, %v563_v8  ;;  %v731_v24 = vsub.s32 1, %v2415_v45 }
 0x7e5   :  { %v1894_v29 = vpop.eup %1893 }
 0x7e6   :  { %v566_v32 = vmul.f32 %v1894_v29, %v1886_v60  ;;  %1741 = vmatprep.mubr.msk.bf16.mxu1 %vm373_vm4, %v567_v27  ;;  %v732_v25 = vrot.slane %v2421_v47, %v731_v24  ;;  %v737_v27 = vsub.s32 2, %v2415_v45 }
 0x7e8   :  { %v568_v33 = vpack.c.bf16 %v566_v32, %v565_v31 }
 0x7ea   :  { %1742 = vmatmul.mubr.msk.bf16.vlgmr.msra.gmra.mrb[8].mxu1 %vm373_vm4, %v568_v33 }
 0x7eb   :  { %1749 = vmatprep.mubr.msk.bf16.mxu1 %vm2078_vm2, %v2077_v7  ;;  %1746 = vmatpush3.bf16.msra.mxu1 %v1859_v34 }
 0x7ec   :  { %1747 = vmatprep.subr.bf16.mxu1 %v2077_v7 }
 0x7ef   :  { %1748 = vmatpush3.bf16.msra.mxu1 %v1860_v35  ;;  %v738_v35 = vrot.slane %v2421_v47, %v737_v27 }
 0x7f0   :  { %1761 = vmatprep.subr.bf16.mxu1 %v2077_v7 }
 0x8bd   :  { %v1743_v36 = vpop.f32.mrb[8].mxu1 }
 0x8be   :  { %v617_v38 = vpop.f32.mrb[9].mxu1 }
 0x8bf   :  { %v632_v39 = vadd.f32 %v1743_v36, %v617_v38  ;;  %v1744_v40 = vpop.f32.mrb[10].mxu1 }
 0x8c0   :  { %v620_v41 = vpop.f32.mrb[11].mxu1 }
 0x8c1   :  { %v633_v42 = vadd.f32 %v1744_v40, %v620_v41  ;;  %v1865_v41 = vld [vmem:[%s2658_s11 + $0x10] sm:$0xff]  }
 0x8c3   :  { %v635_v43 = vpack.c.bf16 %v633_v42, %v632_v39  ;;  %v1866_v42 = vld [vmem:[%s2658_s11 + $0x18] sm:$0xff]  }
 0x8c5   :  { %1750 = vmatmul.mubr.msk.bf16.vlgmr.msra.gmra.mrb[12].mxu1 %vm373_vm4, %v635_v43  ;;  %v1603_v43 = vld [vmem:[#allocation8] ss:$0 sm:$0xff] }
 0x8c6   :  { %1769 = vmatprep.mubr.msk.bf16.mxu1 %vm2078_vm2, %v2077_v7  ;;  %1762 = vmatpush3.bf16.msra.mxu1 %v1863_v18 }
 0x8c7   :  { %1763 = vmatprep.subr.bf16.mxu1 %v2077_v7 }
 0x8ca   :  { %1764 = vmatpush3.bf16.msra.mxu1 %v1864_v19 }
 0x8cb   :  { %1765 = vmatprep.subr.bf16.mxu1 %v2077_v7 }
 0x8ce   :  { %1766 = vmatpush3.bf16.msra.mxu1 %v1865_v41 }
 0x8cf   :  { %1767 = vmatprep.subr.bf16.mxu1 %v2077_v7 }
 0x8d2   :  { %1768 = vmatpush3.bf16.msra.mxu1 %v1866_v42 }
 0x998   :  { %v693_v49 = vpop.f32.mrb[12].mxu1 }
 0x999   :  { %v694_v50 = vadd.f32 %v693_v49, %v643_v48  ;;  %v1751_v51 = vpop.f32.mrb[13].mxu1 }
 0x99a   :  { %v696_v52 = vpop.f32.mrb[14].mxu1 }
 0x99b   :  { %v697_v53 = vadd.f32 %v696_v52, %v643_v48  ;;  %v1752_v55 = vpop.f32.mrb[15].mxu1  ;;  %v700_v56 = vadd.f32 %v694_v50, %v2310_v0 }
 0x99d   :  { %v702_v54 = vsel %vm373_vm4, %v700_v56, 0.0  ;;  %v701_v57 = vadd.f32 %v697_v53, %v2312_v1  ;;  %v1861_v1 = vld [vmem:[%s2656_s9] sm:$0xff]  }
 0x99e   :  { %703 = vadd.xlane.f32.xlu1 %v702_v54  ;;  %1754 = vmatpush3.bf16.msra.mxu0 %v1861_v1  ;;  %v822_v54 = vsub.s32 3, %v2415_v45 }
 0x99f   :  { %v705_v58 = vsel %vm373_vm4, %v701_v57, 0.0  ;;  %1755 = vmatprep.subr.bf16.mxu0 %v2077_v7 }
 0x9a0   :  { %706 = vadd.xlane.f32.xlu0 %v705_v58 }
 0x9a2   :  { %1756 = vmatpush3.bf16.msra.mxu0 %v1862_v17 }
 0x9a3   :  { %1773 = vmatprep.subr.bf16.mxu0 %v2077_v7 }
 0xa2b   :  { %v704_v59 = vpop.xlane.xlu1 %703 }
 0xa2c   :  { %v709_v60 = vmul.f32 0.03125, %v704_v59 }
 0xa2d   :  { %v707_v62 = vpop.xlane.xlu0 %706 }
 0xa2e   :  { %v711_v2 = vsub.f32 %v700_v56, %v709_v60  ;;  %v710_v5 = vmul.f32 0.03125, %v707_v62 }
 0xa30   :  { %v712_v6 = vsub.f32 %v701_v57, %v710_v5  ;;  %v713_v14 = vmul.f32 %v711_v2, %v711_v2  ;;  %v823_v57 = vrot.slane %v2421_v47, %v822_v54 }
 0xa32   :  { %v715_v15 = vsel %vm373_vm4, %v713_v14, 0.0  ;;  %v714_v16 = vmul.f32 %v712_v6, %v712_v6 }
 0xa33   :  { %716 = vadd.xlane.f32.xlu1 %v715_v15 }
 0xa34   :  { %v718_v0 = vsel %vm373_vm4, %v714_v16, 0.0 }
 0xa35   :  { %719 = vadd.xlane.f32.xlu0 %v718_v0 }
 0xac0   :  { %v717_v20 = vpop.xlane.xlu1 %716 }
 0xac1   :  { %v721_v21 = vmul.f32 0.03125, %v717_v20 }
 0xac2   :  { %v720_v22 = vpop.xlane.xlu0 %719 }
 0xac3   :  { %v723_v23 = vadd.f32 1e-05, %v721_v21  ;;  %v722_v13 = vmul.f32 0.03125, %v720_v22 }
 0xac5   :  { %1895 = vrsqrt.f32 %v723_v23  ;;  %v724_v8 = vadd.f32 1e-05, %v722_v13 }
 0xac7   :  { %1897 = vrsqrt.f32 %v724_v8  ;;  %v1867_v8 = vld [vmem:[%s2652_s5 + $0x10] sm:$0xff]  }
 0xacf   :  { %v1896_v29 = vpop.eup %1895 }
 0xad0   :  { %v727_v31 = vmul.f32 %v1896_v29, %v711_v2 }
 0xad1   :  { %v1898_v32 = vpop.eup %1897 }
 0xad2   :  { %v733_v33 = vmul.f32 %v732_v25, %v727_v31  ;;  %v728_v34 = vmul.f32 %v1898_v32, %v712_v6 }
 0xad4   :  { %v734_v36 = vmul.f32 %v732_v25, %v728_v34  ;;  %v739_v38 = vadd.f32 %v738_v35, %v733_v33  ;;  %v1868_v25 = vld [vmem:[%s2652_s5 + $0x18] sm:$0xff]   ;;  %s2037_s5 = scalar_lea.vmem %s1570_s0, 256 }
 0xad5   :  { %p2038_p12 = scmp.ne.s32.totalorder %s1570_s0, %s2037_s5  ;;  %p2043_p0 = scmp.lt.s32.totalorder %s2037_s5, %s2037_s5 }
 0xad6   :  { %v740_v39 = vadd.f32 %v738_v35, %v734_v36  ;;  %v923_v36 = vsub.s32 4, %v2415_v45 }
 0xad7   :  { %p2044_p1 = por %p2043_p0, %p2042_p13 }
 0xad8   :  { %v741_v40 = vpack.c.bf16 %v740_v39, %v739_v38 }
 0xad9   :  { %p2045_p2 = pnand %p2044_p1, %p2038_p12 }
 0xada   :  { %1758 = vmatmul.mubr.msk.bf16.vlgmr.msra.gmra.mrb[12].mxu0 %vm373_vm4, %v741_v40 }
 0xadb   :  { %1777 = vmatprep.mubr.msk.bf16.mxu0 %vm2078_vm2, %v2077_v7  ;;  %1774 = vmatpush3.bf16.msra.mxu0 %v1867_v8 }
 0xadc   :  { %1775 = vmatprep.subr.bf16.mxu0 %v2077_v7 }
 0xadf   :  { %1776 = vmatpush3.bf16.msra.mxu0 %v1868_v25 }
 0xbad   :  { %v802_v44 = vpop.f32.mrb[12].mxu0 }
 0xbae   :  { %v803_v48 = vadd.f32 %v1603_v43, %v802_v44  ;;  %v1759_v49 = vpop.f32.mrb[13].mxu0 }
 0xbaf   :  { %v805_v50 = vpop.f32.mrb[14].mxu0 }
 0xbb0   :  { %v806_v51 = vadd.f32 %v1603_v43, %v805_v50  ;;  %v1760_v52 = vpop.f32.mrb[15].mxu0  ;;  %v809_v53 = vmax.f32 %v803_v48, 0.0 }
 0xbb2   :  { %v810_v55 = vmax.f32 %v806_v51, 0.0 }
 0xbb4   :  { %v811_v56 = vpack.c.bf16 %v810_v55, %v809_v53  ;;  %v1617_v53 = vld [vmem:[%s2653_s6 + $0x1] ss:$0 sm:$0xff] }
 0xbb6   :  { %1770 = vmatmul.mubr.msk.bf16.vlgmr.msra.gmra.mrb[16].mxu1 %vm848_vm5, %v811_v56 }
 0xc89   :  { %v886_v58 = vpop.f32.mrb[16].mxu1 }
 0xc8a   :  { %v887_v59 = vadd.f32 %v886_v58, %v823_v57  ;;  %v1771_v60 = vpop.f32.mrb[17].mxu1 }
 0xc8b   :  { %v889_v62 = vpop.f32.mrb[18].mxu1 }
 0xc8c   :  { %v890_v2 = vadd.f32 %v889_v62, %v823_v57  ;;  %v1772_v5 = vpop.f32.mrb[19].mxu1  ;;  %v893_v6 = vadd.f32 %v887_v59, %v739_v38  ;;  %v924_v38 = vrot.slane %v2421_v47, %v923_v36 }
 0xc8e   :  { %v895_v14 = vsel %vm373_vm4, %v893_v6, 0.0  ;;  %v894_v15 = vadd.f32 %v890_v2, %v740_v39  ;;  %v929_v39 = vsub.s32 5, %v2415_v45 }
 0xc8f   :  { %896 = vadd.xlane.f32.xlu1 %v895_v14 }
 0xc90   :  { %v898_v16 = vsel %vm373_vm4, %v894_v15, 0.0  ;;  %v930_v48 = vrot.slane %v2421_v47, %v929_v39 }
 0xc91   :  { %899 = vadd.xlane.f32.xlu0 %v898_v16 }
 0xd1c   :  { %v897_v0 = vpop.xlane.xlu1 %896 }
 0xd1d   :  { %v901_v1 = vmul.f32 0.03125, %v897_v0 }
 0xd1e   :  { %v900_v17 = vpop.xlane.xlu0 %899 }
 0xd1f   :  { %v903_v18 = vsub.f32 %v893_v6, %v901_v1  ;;  %v902_v19 = vmul.f32 0.03125, %v900_v17 }
 0xd21   :  { %v904_v20 = vsub.f32 %v894_v15, %v902_v19  ;;  %v905_v21 = vmul.f32 %v903_v18, %v903_v18 }
 0xd23   :  { %v907_v22 = vsel %vm373_vm4, %v905_v21, 0.0  ;;  %v906_v23 = vmul.f32 %v904_v20, %v904_v20 }
 0xd24   :  { %908 = vadd.xlane.f32.xlu1 %v907_v22 }
 0xd25   :  { %v910_v13 = vsel %vm373_vm4, %v906_v23, 0.0 }
 0xd26   :  { %911 = vadd.xlane.f32.xlu0 %v910_v13 }
 0xdb1   :  { %v909_v29 = vpop.xlane.xlu1 %908 }
 0xdb2   :  { %v913_v31 = vmul.f32 0.03125, %v909_v29 }
 0xdb3   :  { %v912_v32 = vpop.xlane.xlu0 %911 }
 0xdb4   :  { %v915_v33 = vadd.f32 1e-05, %v913_v31  ;;  %v914_v34 = vmul.f32 0.03125, %v912_v32 }
 0xdb6   :  { %1899 = vrsqrt.f32 %v915_v33  ;;  %v916_v35 = vadd.f32 1e-05, %v914_v34 }
 0xdb8   :  { %1901 = vrsqrt.f32 %v916_v35 }
 0xdc0   :  { %v1900_v40 = vpop.eup %1899 }
 0xdc1   :  { %v919_v41 = vmul.f32 %v1900_v40, %v903_v18 }
 0xdc2   :  { %v1902_v42 = vpop.eup %1901 }
 0xdc3   :  { %v925_v43 = vmul.f32 %v924_v38, %v919_v41  ;;  %v920_v44 = vmul.f32 %v1902_v42, %v904_v20 }
 0xdc5   :  { %v926_v49 = vmul.f32 %v924_v38, %v920_v44  ;;  %v2490_v50 = vadd.f32 %v930_v48, %v925_v43 }
 0xdc7   :  { %v2492_v51 = vadd.f32 %v930_v48, %v926_v49 }
 0xdc9   :  { %v933_v52 = vpack.c.bf16 %v2492_v51, %v2490_v50 }
 0xdcb   :  { %1778 = vmatmul.mubr.msk.bf16.vlgmr.msra.gmra.mrb[16].mxu0 %vm373_vm4, %v933_v52 }
 0xe9e   :  { %v996_v55 = vpop.f32.mrb[16].mxu0 }
 0xe9f   :  { %v997_v56 = vadd.f32 %v1617_v53, %v996_v55  ;;  %v1779_v57 = vpop.f32.mrb[17].mxu0 }
 0xea0   :  { %v999_v58 = vpop.f32.mrb[18].mxu0 }
 0xea1   :  { %v1000_v59 = vadd.f32 %v1617_v53, %v999_v58  ;;  %v1780_v47 = vpop.f32.mrb[19].mxu0  ;;  %v1006_v60 = vmul.f32 %v997_v56, %v2326_v10  ;;  %v1004_v62 = vmul.f32 %v997_v56, %v2317_v3  ;;  %v2503_v2 = vmul.f32 %v997_v56, %v2383_v63 }
 0xea2   :  { %v2511_v16 = vmul.f32 %v997_v56, %v2389_v9 }
 0xea3   :  { %v1003_v5 = vpack.c.bf16 %v1000_v59, %v997_v56  ;;  %v1007_v6 = vmul.f32 %v1000_v59, %v2328_v12  ;;  %v1005_v14 = vmul.f32 %v1000_v59, %v2319_v4  ;;  %v2508_v15 = vmul.f32 %v1000_v59, %v2380_v61 }
 0xea4   :  { %v2514_v0 = vmul.f32 %v1000_v59, %v2392_v11 }
 0xea5   :  { %1785 = vmatprep.mubr.msk.bf16.mxu0 %vm373_vm4, %v1003_v5  ;;  %v1009_v3 = vpack.c.bf16 %v1007_v6, %v1006_v60  ;;  %v1008_v10 = vpack.c.bf16 %v1005_v14, %v1004_v62  ;;  %v1014_v63 = vpack.c.bf16 %v2508_v15, %v2503_v2 }
 0xea6   :  { %v1015_v12 = vpack.c.bf16 %v2514_v0, %v2511_v16 }
 0xea7   :  { %1020 = vrot.lane.b32.xlu0 %v1009_v3, %s2082_s4  ;;  %1018 = vrot.lane.b32.xlu1 %v1008_v10, %s2082_s4 }
 0xf19   :  { %v1019_v4 = vpop.permute.xlu1 %1018  ;;  %v1021_v9 = vpop.permute.xlu0 %1020 }
 0xf1a   :  { %v1026_v61 = vsel %vm373_vm4, %v1019_v4, 0  ;;  %1835 = vmatprep.subr.msk.bf16.mxu0 %vm373_vm4, %v1019_v4  ;;  %v1029_v11 = vsel %vm373_vm4, %v1021_v9, 0 }
 0xf1b   :  { %1782 = vmatpush3.bf16.xpose.msra.mxu0 %v1026_v61 }
 0xf1c   :  { %1836 = vmatprep.subr.msk.bf16.mxu0 %vm373_vm4, %v1021_v9 }
 0xf23   :  { %1784 = vmatpush3.bf16.xpose.msra.mxu0 %v1029_v11 }
 0xf24   :  { %1805 = vmatprep.subr.bf16.mxu0 %v2077_v7 }
 0xf2a   :  { %1786 = vmatmul.mubr.msk.bf16.vlgmr.msra.gmra.mrb[20].mxu0 %vm373_vm4, %v1003_v5 }
 0xf2b   :  { %1809 = vmatprep.mubr.msk.bf16.mxu0 %vm2078_vm2, %v2077_v7 }
 0xffd   :  { %v1787_v1 = vpop.f32.mrb[20].mxu0 }
 0xffe   :  { %v1065_v17 = vpop.f32.mrb[21].mxu0  ;;  %v1074_v21 = vadd.f32 %v1787_v1, %v2355_v28 }
 0xfff   :  { %v1066_v18 = vadd.f32 %v1065_v17, %v2353_v26  ;;  %v1788_v19 = vpop.f32.mrb[22].mxu0 }
0x1000   :  { %v1068_v20 = vpop.f32.mrb[23].mxu0  ;;  %v1077_v13 = vadd.f32 %v1788_v19, %v2363_v37  ;;  %v1086_v25 = vsel %vm373_vm4, %v1074_v21, -inf  ;;  %v2564_v19 = vld [vmem:[%s2655_s8 + $0x8] sm:$0x3f] }
0x1001   :  { %v1069_v22 = vadd.f32 %v1068_v20, %v2357_v30  ;;  %v1080_v23 = vsel %vm373_vm4, %v1066_v18, -inf  ;;  %v1202_v20 = vrot.slane %v2564_v19, %v642_v46 }
0x1002   :  { %1081 = vmax.xlane.f32.xlu1 %v1080_v23  ;;  %v1089_v29 = vsel %vm373_vm4, %v1077_v13, -inf }
0x1003   :  { %v1083_v8 = vsel %vm373_vm4, %v1069_v22, -inf }
0x1004   :  { %1084 = vmax.xlane.f32.xlu0 %v1083_v8 }
0x1006   :  { %1087 = vmax.xlane.f32.xlu1 %v1086_v25 }
0x1008   :  { %1090 = vmax.xlane.f32.xlu0 %v1089_v29 }
0x108f   :  { %v1082_v26 = vpop.xlane.xlu1 %1081 }
0x1090   :  { %v1092_v31 = vsub.f32 %v1066_v18, %v1082_v26 }
0x1091   :  { %v1085_v32 = vpop.xlane.xlu0 %1084 }
0x1092   :  { %v1093_v33 = vsub.f32 %v1069_v22, %v1085_v32  ;;  %v1096_v34 = vmul.f32 1.442695, %v1092_v31 }
0x1093   :  { %v1088_v28 = vpop.xlane.xlu1 %1087 }
0x1094   :  { %v1094_v30 = vsub.f32 %v1074_v21, %v1088_v28  ;;  %v1098_v37 = vmul.f32 1.442695, %v1093_v33 }
0x1095   :  { %v1091_v35 = vpop.xlane.xlu0 %1090 }
0x1096   :  { %v1100_v38 = vmul.f32 1.442695, %v1094_v30  ;;  %v1095_v40 = vsub.f32 %v1077_v13, %v1091_v35 }
0x1098   :  { %1903 = vpow2.f32 %v1100_v38  ;;  %v1102_v41 = vmul.f32 1.442695, %v1095_v40 }
0x1099   :  { %1905 = vpow2.f32 %v1096_v34 }
0x109a   :  { %1907 = vpow2.f32 %v1102_v41  ;;  %v1872_v41 = vld [vmem:[%s2656_s9 + $0x18] sm:$0xff]  }
0x109b   :  { %1909 = vpow2.f32 %v1098_v37 }
0x10a2   :  { %v1904_v42 = vpop.eup %1903 }
0x10a3   :  { %v1906_v43 = vpop.eup %1905  ;;  %v1110_v44 = vsel %vm373_vm4, %v1904_v42, 0.0 }
0x10a4   :  { %v1908_v48 = vpop.eup %1907  ;;  %1111 = vadd.xlane.f32.xlu1 %v1110_v44  ;;  %v1104_v53 = vsel %vm373_vm4, %v1906_v43, 0.0 }
0x10a5   :  { %v1113_v49 = vsel %vm373_vm4, %v1908_v48, 0.0  ;;  %v1910_v52 = vpop.eup %1909 }
0x10a6   :  { %1114 = vadd.xlane.f32.xlu0 %v1113_v49  ;;  %v1107_v55 = vsel %vm373_vm4, %v1910_v52, 0.0 }
0x10a8   :  { %1105 = vadd.xlane.f32.xlu1 %v1104_v53 }
0x10aa   :  { %1108 = vadd.xlane.f32.xlu0 %v1107_v55 }
0x10b9   :  { %1128 = vrot.lane.b32.xlu1 %v1014_v63, %s2079_s29  ;;  %v1869_v63 = vld [vmem:[%s2654_s7 + $0x10] sm:$0xff]  }
0x10c0   :  { %1130 = vrot.lane.b32.xlu0 %v1015_v12, %s2079_s29  ;;  %v1870_v12 = vld [vmem:[%s2654_s7 + $0x18] sm:$0xff]  }
0x1131   :  { %v1112_v56 = vpop.xlane.xlu1 %1111 }
0x1133   :  { %v1115_v57 = vpop.xlane.xlu0 %1114 }
0x1134   :  { %1911 = vrcp.f32 %v1115_v57 }
0x1135   :  { %v1106_v58 = vpop.xlane.xlu1 %1105 }
0x1136   :  { %1913 = vrcp.f32 %v1106_v58 }
0x1137   :  { %1915 = vrcp.f32 %v1112_v56  ;;  %v1109_v59 = vpop.xlane.xlu0 %1108  ;;  %v1290_v56 = vrot.slane %v2564_v19, %v731_v24  ;;  %v1875_v24 = vld [vmem:[%s2658_s11 + $0x30] sm:$0xff]  }
0x1138   :  { %1917 = vrcp.f32 %v1109_v59 }
0x1139   :  { %v1129_v47 = vpop.permute.xlu1 %1128 }
0x113a   :  { %1789 = vmatprep.subr.bf16.mxu1 %v1129_v47 }
0x113b   :  { %v1131_v60 = vpop.permute.xlu0 %1130  ;;  %1790 = vmatpush3.bf16.msra.mxu1 %v1129_v47 }
0x113c   :  { %1791 = vmatprep.subr.bf16.mxu1 %v1131_v60 }
0x113e   :  { %v1912_v62 = vpop.eup %1911 }
0x113f   :  { %1792 = vmatpush3.bf16.msra.mxu1 %v1131_v60  ;;  %v1123_v14 = vmul.f32 %v1912_v62, %v1908_v48  ;;  %v1296_v62 = vrot.slane %v2564_v19, %v737_v27  ;;  %v1876_v27 = vld [vmem:[%s2658_s11 + $0x38] sm:$0xff]  }
0x1140   :  { %v1914_v2 = vpop.eup %1913  ;;  %1797 = vmatprep.subr.bf16.mxu1 %v2077_v7 }
0x1141   :  { %v1916_v5 = vpop.eup %1915  ;;  %v1120_v15 = vmul.f32 %v1914_v2, %v1906_v43  ;;  %v1874_v43 = vld [vmem:[%s2658_s11 + $0x28] sm:$0xff]  }
0x1142   :  { %v1918_v6 = vpop.eup %1917  ;;  %v1122_v0 = vmul.f32 %v1916_v5, %v1904_v42  ;;  %v1873_v42 = vld [vmem:[%s2658_s11 + $0x20] sm:$0xff]  }
0x1143   :  { %v1121_v16 = vmul.f32 %v1918_v6, %v1910_v52 }
0x1144   :  { %v1125_v10 = vpack.c.bf16 %v1123_v14, %v1122_v0 }
0x1145   :  { %v1124_v3 = vpack.c.bf16 %v1121_v16, %v1120_v15  ;;  %v1637_v15 = vld [vmem:[#allocation8 + $0x1] ss:$0 sm:$0xff] }
0x1147   :  { %1793 = vmatprep.mubr.msk.bf16.mxu1 %vm373_vm4, %v1124_v3 }
0x1148   :  { %1794 = vmatmul.mubr.msk.bf16.vlgmr.msra.gmra.mrb[20].mxu1 %vm373_vm4, %v1125_v10 }
0x1149   :  { %1801 = vmatprep.mubr.msk.bf16.mxu1 %vm2078_vm2, %v2077_v7  ;;  %1798 = vmatpush3.bf16.msra.mxu1 %v1869_v63 }
0x114a   :  { %1799 = vmatprep.subr.bf16.mxu1 %v2077_v7 }
0x114d   :  { %1800 = vmatpush3.bf16.msra.mxu1 %v1870_v12 }
0x114e   :  { %1813 = vmatprep.subr.bf16.mxu1 %v2077_v7 }
0x121b   :  { %v1795_v4 = vpop.f32.mrb[20].mxu1 }
0x121c   :  { %v1174_v61 = vpop.f32.mrb[21].mxu1 }
0x121d   :  { %v1189_v9 = vadd.f32 %v1795_v4, %v1174_v61  ;;  %v1796_v11 = vpop.f32.mrb[22].mxu1 }
0x121e   :  { %v1177_v1 = vpop.f32.mrb[23].mxu1 }
0x121f   :  { %v1190_v17 = vadd.f32 %v1796_v11, %v1177_v1  ;;  %v1384_v11 = vrot.slane %v2564_v19, %v822_v54 }
0x1221   :  { %v1193_v18 = vpack.c.bf16 %v1190_v17, %v1189_v9 }
0x1223   :  { %1802 = vmatmul.mubr.msk.bf16.vlgmr.msra.gmra.mrb[24].mxu1 %vm373_vm4, %v1193_v18 }
0x1224   :  { %1821 = vmatprep.mubr.msk.bf16.mxu1 %vm2078_vm2, %v2077_v7  ;;  %1814 = vmatpush3.bf16.msra.mxu1 %v1873_v42 }
0x1225   :  { %1815 = vmatprep.subr.bf16.mxu1 %v2077_v7 }
0x1228   :  { %1816 = vmatpush3.bf16.msra.mxu1 %v1874_v43  ;;  %v1484_v43 = vrot.slane %v2564_v19, %v923_v36 }
0x1229   :  { %1817 = vmatprep.subr.bf16.mxu1 %v2077_v7 }
0x122c   :  { %1818 = vmatpush3.bf16.msra.mxu1 %v1875_v24 }
0x122d   :  { %1819 = vmatprep.subr.bf16.mxu1 %v2077_v7 }
0x1230   :  { %1820 = vmatpush3.bf16.msra.mxu1 %v1876_v27 }
0x12f6   :  { %v1252_v21 = vpop.f32.mrb[24].mxu1 }
0x12f7   :  { %v1253_v22 = vadd.f32 %v1252_v21, %v1202_v20  ;;  %v1803_v23 = vpop.f32.mrb[25].mxu1 }
0x12f8   :  { %v1255_v13 = vpop.f32.mrb[26].mxu1 }
0x12f9   :  { %v1256_v8 = vadd.f32 %v1255_v13, %v1202_v20  ;;  %v1804_v25 = vpop.f32.mrb[27].mxu1  ;;  %v1259_v29 = vadd.f32 %v1253_v22, %v2490_v50 }
0x12fb   :  { %v1261_v26 = vsel %vm373_vm4, %v1259_v29, 0.0  ;;  %v1260_v31 = vadd.f32 %v1256_v8, %v2492_v51  ;;  %v1871_v51 = vld [vmem:[%s2656_s9 + $0x10] sm:$0xff]  }
0x12fc   :  { %1262 = vadd.xlane.f32.xlu1 %v1261_v26  ;;  %1806 = vmatpush3.bf16.msra.mxu0 %v1871_v51 }
0x12fd   :  { %v1264_v32 = vsel %vm373_vm4, %v1260_v31, 0.0  ;;  %1807 = vmatprep.subr.bf16.mxu0 %v2077_v7 }
0x12fe   :  { %1265 = vadd.xlane.f32.xlu0 %v1264_v32 }
0x1300   :  { %1808 = vmatpush3.bf16.msra.mxu0 %v1872_v41 }
0x1301   :  { %1825 = vmatprep.subr.bf16.mxu0 %v2077_v7 }
0x1389   :  { %v1263_v28 = vpop.xlane.xlu1 %1262 }
0x138a   :  { %v1267_v33 = vmul.f32 0.03125, %v1263_v28 }
0x138b   :  { %v1266_v30 = vpop.xlane.xlu0 %1265 }
0x138c   :  { %v1269_v46 = vsub.f32 %v1259_v29, %v1267_v33  ;;  %v1268_v34 = vmul.f32 0.03125, %v1266_v30 }
0x138e   :  { %v1270_v35 = vsub.f32 %v1260_v31, %v1268_v34  ;;  %v1271_v38 = vmul.f32 %v1269_v46, %v1269_v46 }
0x1390   :  { %v1273_v40 = vsel %vm373_vm4, %v1271_v38, 0.0  ;;  %v1272_v37 = vmul.f32 %v1270_v35, %v1270_v35  ;;  %v1878_v38 = vld [vmem:[%s2659_s12 + $0x8] sm:$0xff]  }
0x1391   :  { %1274 = vadd.xlane.f32.xlu1 %v1273_v40 }
0x1392   :  { %v1276_v50 = vsel %vm373_vm4, %v1272_v37, 0.0 }
0x1393   :  { %1277 = vadd.xlane.f32.xlu0 %v1276_v50 }
0x141e   :  { %v1275_v44 = vpop.xlane.xlu1 %1274 }
0x141f   :  { %v1279_v48 = vmul.f32 0.03125, %v1275_v44 }
0x1420   :  { %v1278_v49 = vpop.xlane.xlu0 %1277 }
0x1421   :  { %v1281_v52 = vadd.f32 1e-05, %v1279_v48  ;;  %v1280_v53 = vmul.f32 0.03125, %v1278_v49 }
0x1423   :  { %1919 = vrsqrt.f32 %v1281_v52  ;;  %v1282_v55 = vadd.f32 1e-05, %v1280_v53 }
0x1425   :  { %1921 = vrsqrt.f32 %v1282_v55 }
0x142d   :  { %v1920_v57 = vpop.eup %1919 }
0x142e   :  { %v1285_v58 = vmul.f32 %v1920_v57, %v1269_v46 }
0x142f   :  { %v1922_v59 = vpop.eup %1921 }
0x1430   :  { %v1291_v47 = vmul.f32 %v1290_v56, %v1285_v58  ;;  %v1286_v60 = vmul.f32 %v1922_v59, %v1270_v35  ;;  %v1877_v35 = vld [vmem:[%s2659_s12] sm:$0xff]  }
0x1431   :  { %v1654_v59 = vld [vmem:[%s2660_s13] ss:$0 sm:$0xff] }
0x1432   :  { %v1292_v2 = vmul.f32 %v1290_v56, %v1286_v60  ;;  %v1297_v5 = vadd.f32 %v1296_v62, %v1291_v47 }
0x1434   :  { %v1298_v6 = vadd.f32 %v1296_v62, %v1292_v2 }
0x1436   :  { %v1299_v14 = vpack.c.bf16 %v1298_v6, %v1297_v5 }
0x1438   :  { %1810 = vmatmul.mubr.msk.bf16.vlgmr.msra.gmra.mrb[24].mxu0 %vm373_vm4, %v1299_v14 }
0x1439   :  { %1829 = vmatprep.mubr.msk.bf16.mxu0 %vm2078_vm2, %v2077_v7  ;;  %1826 = vmatpush3.bf16.msra.mxu0 %v1877_v35 }
0x143a   :  { %1827 = vmatprep.subr.bf16.mxu0 %v2077_v7  ;;  %v1490_v7 = vrot.slane %v2564_v19, %v929_v39 }
0x143d   :  { %1828 = vmatpush3.bf16.msra.mxu0 %v1878_v38 }
0x150b   :  { %v1362_v16 = vpop.f32.mrb[24].mxu0 }
0x150c   :  { %v1363_v0 = vadd.f32 %v1637_v15, %v1362_v16  ;;  %v1811_v3 = vpop.f32.mrb[25].mxu0 }
0x150d   :  { %v1365_v10 = vpop.f32.mrb[26].mxu0 }
0x150e   :  { %v1366_v63 = vadd.f32 %v1637_v15, %v1365_v10  ;;  %v1812_v12 = vpop.f32.mrb[27].mxu0  ;;  %v1369_v4 = vmax.f32 %v1363_v0, 0.0 }
0x1510   :  { %v1370_v61 = vmax.f32 %v1366_v63, 0.0 }
0x1512   :  { %v1371_v9 = vpack.c.bf16 %v1370_v61, %v1369_v4 }
0x1514   :  { %1822 = vmatmul.mubr.msk.bf16.vlgmr.msra.gmra.mrb[28].mxu1 %vm848_vm5, %v1371_v9 }
0x15e7   :  { %v1446_v1 = vpop.f32.mrb[28].mxu1 }
0x15e8   :  { %v1447_v17 = vadd.f32 %v1446_v1, %v1384_v11  ;;  %v1823_v18 = vpop.f32.mrb[29].mxu1 }
0x15e9   :  { %v1449_v20 = vpop.f32.mrb[30].mxu1 }
0x15ea   :  { %v1450_v21 = vadd.f32 %v1449_v20, %v1384_v11  ;;  %v1824_v22 = vpop.f32.mrb[31].mxu1  ;;  %v1453_v23 = vadd.f32 %v1447_v17, %v1297_v5 }
0x15ec   :  { %v1455_v13 = vsel %vm373_vm4, %v1453_v23, 0.0  ;;  %v1454_v8 = vadd.f32 %v1450_v21, %v1298_v6 }
0x15ed   :  { %1456 = vadd.xlane.f32.xlu1 %v1455_v13 }
0x15ee   :  { %v1458_v25 = vsel %vm373_vm4, %v1454_v8, 0.0 }
0x15ef   :  { %1459 = vadd.xlane.f32.xlu0 %v1458_v25 }
0x167a   :  { %v1457_v29 = vpop.xlane.xlu1 %1456 }
0x167b   :  { %v1461_v26 = vmul.f32 0.03125, %v1457_v29 }
0x167c   :  { %v1460_v31 = vpop.xlane.xlu0 %1459 }
0x167d   :  { %v1463_v32 = vsub.f32 %v1453_v23, %v1461_v26  ;;  %v1462_v28 = vmul.f32 0.03125, %v1460_v31 }
0x167f   :  { %v1464_v54 = vsub.f32 %v1454_v8, %v1462_v28  ;;  %v1465_v33 = vmul.f32 %v1463_v32, %v1463_v32 }
0x1681   :  { %v1467_v30 = vsel %vm373_vm4, %v1465_v33, 0.0  ;;  %v1466_v46 = vmul.f32 %v1464_v54, %v1464_v54 }
0x1682   :  { %1468 = vadd.xlane.f32.xlu1 %v1467_v30 }
0x1683   :  { %v1470_v34 = vsel %vm373_vm4, %v1466_v46, 0.0 }
0x1684   :  { %1471 = vadd.xlane.f32.xlu0 %v1470_v34 }
0x170f   :  { %v1469_v40 = vpop.xlane.xlu1 %1468 }
0x1710   :  { %v1473_v37 = vmul.f32 0.03125, %v1469_v40 }
0x1711   :  { %v1472_v50 = vpop.xlane.xlu0 %1471 }
0x1712   :  { %v1475_v51 = vadd.f32 1e-05, %v1473_v37  ;;  %v1474_v41 = vmul.f32 0.03125, %v1472_v50 }
0x1714   :  { %1923 = vrsqrt.f32 %v1475_v51  ;;  %v1476_v42 = vadd.f32 1e-05, %v1474_v41 }
0x1716   :  { %1925 = vrsqrt.f32 %v1476_v42 }
0x171e   :  { %v1924_v44 = vpop.eup %1923 }
0x171f   :  { %v1479_v48 = vmul.f32 %v1924_v44, %v1463_v32 }
0x1720   :  { %v1926_v49 = vpop.eup %1925 }
0x1721   :  { %v1485_v52 = vmul.f32 %v1484_v43, %v1479_v48  ;;  %v1480_v53 = vmul.f32 %v1926_v49, %v1464_v54 }
0x1723   :  { %v1486_v55 = vmul.f32 %v1484_v43, %v1480_v53  ;;  %v1491_v56 = vadd.f32 %v1490_v7, %v1485_v52 }
0x1725   :  { %v1492_v57 = vadd.f32 %v1490_v7, %v1486_v55 }
0x1727   :  { %v1493_v58 = vpack.c.bf16 %v1492_v57, %v1491_v56 }
0x1729   :  { %1830 = vmatmul.mubr.msk.bf16.vlgmr.msra.gmra.mrb[28].mxu0 %vm373_vm4, %v1493_v58 }
0x17fc   :  { %v1554_v36 = vpop.f32.mrb[28].mxu0 }
0x17fd   :  { %v1555_v47 = vadd.f32 %v1654_v59, %v1554_v36  ;;  %v1831_v60 = vpop.f32.mrb[29].mxu0 }
0x17fe   :  { %v1557_v62 = vpop.f32.mrb[30].mxu0 }
0x17ff   :  { %v1558_v45 = vadd.f32 %v1654_v59, %v1557_v62  ;;  %v1832_v2 = vpop.f32.mrb[31].mxu0  ;;  %1562 = vst.msk [vmem:[#allocation11] sm:$0xff] %vm1561_vm6, %v1555_v47 }
0x1801   :  { %1563 = vst.msk [vmem:[#allocation11 + $0x8] sm:$0xff] %vm1561_vm6, %v1558_v45 }
0x1802   :  { %2048 = shalt.err (!%p2045_p2)
}
0x1803   :  { %s2675_s6 = sld [smem:[#allocation17_spill]] }
0x1809   :  { %s2049_s29 = scalar_lea.hbm %s2675_s6, 256 }
0x180a   :  { %p2050_p3 = scmp.ne.s32.totalorder %s2675_s6, %s2049_s29  ;;  %p2053_p4 = scmp.lt.u32.totalorder %s2049_s29, %s2675_s6 }
0x180c   :  { %p2055_p5 = pnand %p2053_p4, %p2050_p3 }
0x180e   :  { %2058 = shalt.err (!%p2055_p5)
}
0x180f   :  { %1575 = dma.vmem_to_hbm [thread:$0]  %s1570_s0, 256, %s2675_s6, [#allocation4], %s2674_s22, %s2674_s22, %s2673_s24  }
0x1810   :  { %2065 = dma.done.wait [#allocation4], 256  }
0x1811   :  { %2066 = vsyncadd [#allocation4], 4294967040 }
0x1812   :  { %1579 = vsyncpa [#allocation3], 1 }
0x1813   :  { %1580 = vsyncpa [#allocation6], 1 }
0x1814   :  { %1581 = vsyncpa [#allocation9], 1 }
0x1815   :  { %1582 = vsyncpa [#allocation4], 1 }

</bundles_post_ra>
